<compile_context>
chip_gen: v5e
topology: v5e:2x2
jax: 0.10.0
libtpu: 0.0.40
codegen_flags: <defaults>
</compile_context>

<pallas_src>
import functools

import jax
import jax.numpy as jnp
from jax.experimental import pallas as pl
from jax.experimental.pallas import tpu as pltpu


# ----------------------------------------------------------------------------
# Kernel
# ----------------------------------------------------------------------------
def _s2t_kernel(elu_in_bf16, x_ref, mask_ref, w1_ref, b1_ref, w2_ref, b2_ref,
                out_ref):
    # x_ref:    (BT, S, D)  bf16  activations (S, D already padded)
    # mask_ref: (BT, S, 1)  f32   {0,1} sequence mask (0 on padded rows)
    # w*_ref:   (D, D)      bf16  weights stored (in, out): fc(x) = x @ W + b
    # b*_ref:   (1, D)      f32
    # out_ref:  (BT, D)     f32   lane-dense pooled output
    BT, S, D = x_ref.shape
    x = x_ref[...]                       # (BT, S, D) bf16
    m3 = mask_ref[...]                   # (BT, S, 1) f32

    # --- fc1 + ELU, fc2: flattened (BT*S, D) matmuls (bf16 operands, f32 acc).
    #     S % 16 == 0 and D % 128 == 0 so the reshapes are layout no-ops.
    x2 = x.reshape(BT * S, D)
    h1 = jnp.dot(x2, w1_ref[...], preferred_element_type=jnp.float32) + b1_ref[...]

    # ELU (alpha=1) with guarded exp: exp only ever sees non-positive inputs.
    if elu_in_bf16:
        # bf16 VPU/EUP (v6e/v7x): elementwise chain in bf16, feeds MXU directly.
        h1b = h1.astype(jnp.bfloat16)
        map1 = jnp.where(h1b > 0, h1b, jnp.exp(jnp.minimum(h1b, 0.0)) - 1.0)
    else:
        # v5e has no bf16 VPU/EUP: keep elementwise math f32, cast once.
        m1 = jnp.where(h1 > 0, h1, jnp.exp(jnp.minimum(h1, 0.0)) - 1.0)
        map1 = m1.astype(jnp.bfloat16)

    map2 = jnp.dot(map1, w2_ref[...], preferred_element_type=jnp.float32) + b2_ref[...]
    map2 = map2.reshape(BT, S, D)

    # --- masked softmax over the sequence axis (axis 1), matching the
    #     reference's multiplicative masking (masked rows contribute 0 to the
    #     max; padded rows behave exactly like masked rows and cancel via the
    #     softmax's shift invariance). Normalization is fused into the final
    #     (BT, D) reduction with an EUP reciprocal instead of an (S, D) divide.
    masked_vec = map2 * m3
    max_vec = jnp.max(masked_vec, axis=1, keepdims=True)          # (BT, 1, D)
    exps = jnp.exp(masked_vec - max_vec)
    masked_exps = exps * m3                                       # (BT, S, D)
    masked_sums = jnp.sum(masked_exps, axis=1)                    # (BT, D)
    masked_sums = masked_sums + (masked_sums == 0).astype(jnp.float32)
    inv = pl.reciprocal(masked_sums + 1e-20, approx=True)         # (BT, D)

    num = jnp.sum(x.astype(jnp.float32) * masked_exps, axis=1)    # (BT, D)
    out_ref[...] = num * inv


# ----------------------------------------------------------------------------
# Host-side helpers
# ----------------------------------------------------------------------------
def _round_up(x, m):
    return (x + m - 1) // m * m


def _device_kind():
    try:
        return jax.devices()[0].device_kind.lower()
    except Exception:
        return ""


def _elu_in_bf16_for_device():
    kind = _device_kind()
    # bf16 VPU/EUP exists on v6e/v7x; v5e (and unknown chips) stay f32.
    return ("v6" in kind) or ("v7" in kind)


def _prefer_two_grid_steps():
    # v7x has 2 TensorCores per chip; keep the "parallel" batch axis >= 2 steps.
    return "v7" in _device_kind()


def _vmem_limit_bytes():
    cap = None
    try:
        cap = getattr(pltpu.get_tpu_info(), "vmem_capacity_bytes", None)
    except Exception:
        cap = None
    if not cap:
        cap = 64 * 1024 * 1024          # conservative: v7x per-TC capacity
    return int(cap * 0.8)               # ~102 MiB on v5e/v6e, ~51 MiB on v7x


def _choose_bt(batch8, seq_pad, d_pad, block_budget_bytes, prefer_two_steps):
    """Batch elements per grid step, sized against the real live set.

    Per batch element: double-buffered bf16 x block, ~6 live (S, D) f32
    temporaries (h1 / map1 / map2 / exps / masked_exps / staging), the
    double-buffered mask and output rows. Weights/biases counted once
    (single-buffered, grid-invariant).
    """
    per_b = (seq_pad * d_pad * (2 * 2 + 6 * 4)   # x (2 bufs, bf16) + f32 temps
             + seq_pad * 2 * 4                   # mask (2 bufs, f32)
             + d_pad * 2 * 4)                    # output rows (2 bufs, f32)
    weight_bytes = 2 * d_pad * d_pad * 2 + 2 * d_pad * 4
    avail = max(block_budget_bytes - weight_bytes, per_b)
    bt = min(batch8, max(1, avail // per_b))
    bt = max(8, (bt // 8) * 8)                   # sublane-legal multiple of 8
    if prefer_two_steps and batch8 >= 16:
        bt = min(bt, _round_up((batch8 + 1) // 2, 8))
    return min(bt, batch8)


# ----------------------------------------------------------------------------
# Public wrapper
# ----------------------------------------------------------------------------
def source2token(inputs, rep_mask, w1, b1, w2, b2):
    """inputs: (B, S, D) f32, rep_mask: (B, S) {0,1}; returns (B, D) f32.

    Dropout from the PyTorch module is identity here (eval mode).
    Weights stored (in, out): fc(x) = x @ W + b  (== PyTorch x @ W.T + b).
    """
    B, S, D = inputs.shape
    D_pad = _round_up(D, 128)       # lane-dense feature dim
    S_pad = _round_up(S, 16)        # bf16 sublane tile -> reshapes stay no-ops

    elu_in_bf16 = _elu_in_bf16_for_device()
    prefer_two_steps = _prefer_two_grid_steps()
    vmem_limit = _vmem_limit_bytes()
    block_budget = int(vmem_limit * 0.75)   # headroom for compiler scratch

    B8 = _round_up(B, 8)
    BT = _choose_bt(B8, S_pad, D_pad, block_budget, prefer_two_steps)
    B_pad = _round_up(B, BT)
    grid = (B_pad // BT,)

    # Padding is inert: padded batch rows / seq rows carry mask = 0 (their
    # zero masked_vec cancels via softmax shift-invariance and the masked-sum
    # guard), padded feature columns have zero weights/bias so they stay zero.
    x_p = jnp.pad(inputs, ((0, B_pad - B), (0, S_pad - S), (0, D_pad - D)))
    x_bf = x_p.astype(jnp.bfloat16)
    mask3 = jnp.pad(rep_mask.astype(jnp.float32),
                    ((0, B_pad - B), (0, S_pad - S))).reshape(B_pad, S_pad, 1)
    w1_bf = jnp.pad(w1, ((0, D_pad - D), (0, D_pad - D))).astype(jnp.bfloat16)
    w2_bf = jnp.pad(w2, ((0, D_pad - D), (0, D_pad - D))).astype(jnp.bfloat16)
    b1_2d = jnp.pad(b1, (0, D_pad - D)).reshape(1, D_pad).astype(jnp.float32)
    b2_2d = jnp.pad(b2, (0, D_pad - D)).reshape(1, D_pad).astype(jnp.float32)

    cost = pl.CostEstimate(
        flops=4 * B_pad * S_pad * D_pad * D_pad,     # two (B*S,D)x(D,D) matmuls
        transcendentals=2 * B_pad * S_pad * D_pad,   # ELU exp + softmax exp
        bytes_accessed=(B_pad * S_pad * D_pad * 2 + B_pad * S_pad * 4
                        + 2 * D_pad * D_pad * 2 + 2 * D_pad * 4
                        + B_pad * D_pad * 4),
    )

    kernel = functools.partial(_s2t_kernel, elu_in_bf16)

    def build(use_buffered):
        if use_buffered and hasattr(pl, "Buffered"):
            # Grid-invariant operands: single-buffer to reclaim VMEM for BT.
            resident = dict(pipeline_mode=pl.Buffered(1))
        else:
            resident = {}
        in_specs = [
            pl.BlockSpec((BT, S_pad, D_pad), lambda b: (b, 0, 0)),   # x (bf16)
            pl.BlockSpec((BT, S_pad, 1), lambda b: (b, 0, 0)),       # mask
            pl.BlockSpec((D_pad, D_pad), lambda b: (0, 0), **resident),  # w1
            pl.BlockSpec((1, D_pad), lambda b: (0, 0), **resident),      # b1
            pl.BlockSpec((D_pad, D_pad), lambda b: (0, 0), **resident),  # w2
            pl.BlockSpec((1, D_pad), lambda b: (0, 0), **resident),      # b2
        ]
        return pl.pallas_call(
            kernel,
            out_shape=jax.ShapeDtypeStruct((B_pad, D_pad), jnp.float32),
            grid_spec=pltpu.PrefetchScalarGridSpec(
                num_scalar_prefetch=0,
                grid=grid,
                in_specs=in_specs,
                out_specs=pl.BlockSpec((BT, D_pad), lambda b: (b, 0)),
            ),
            compiler_params=pltpu.CompilerParams(
                dimension_semantics=("parallel",),
                vmem_limit_bytes=vmem_limit),
            cost_estimate=cost,
        )

    try:
        out = build(True)(x_bf, mask3, w1_bf, b1_2d, w2_bf, b2_2d)
    except Exception:
        # Fallback if this JAX build rejects pipeline_mode=pl.Buffered(1).
        out = build(False)(x_bf, mask3, w1_bf, b1_2d, w2_bf, b2_2d)
    return out[:B, :D]


# ----------------------------------------------------------------------------
# References
# ----------------------------------------------------------------------------
def _reference_f32(inputs, rep_mask, w1, b1, w2, b2):
    # Faithful f32 reference (PyTorch semantics, dropout = identity).
    mask = rep_mask.astype(jnp.float32)[..., None]                # (B, S, 1)
    h1 = inputs @ w1 + b1
    map1 = jnp.where(h1 > 0, h1, jnp.exp(jnp.minimum(h1, 0.0)) - 1.0)
    map2 = map1 @ w2 + b2
    masked_vec = map2 * mask
    max_vec = jnp.max(masked_vec, axis=1, keepdims=True)
    exps = jnp.exp(masked_vec - max_vec)
    masked_exps = exps * mask
    masked_sums = jnp.sum(masked_exps, axis=1, keepdims=True)
    masked_sums = masked_sums + (masked_sums == 0).astype(jnp.float32)
    soft = masked_exps / (masked_sums + 1e-20)
    return jnp.sum(inputs * soft, axis=1)


def _reference_bf16(inputs, rep_mask, w1, b1, w2, b2, elu_in_bf16):
    # Mirrors the kernel's precision choices (bf16 x / weights, f32 acc,
    # generation-dependent ELU precision, f32 softmax).
    mask = rep_mask.astype(jnp.float32)[..., None]
    x_bf = inputs.astype(jnp.bfloat16)
    h1 = jnp.dot(x_bf, w1.astype(jnp.bfloat16),
                 preferred_element_type=jnp.float32) + b1
    if elu_in_bf16:
        h1b = h1.astype(jnp.bfloat16)
        map1 = jnp.where(h1b > 0, h1b, jnp.exp(jnp.minimum(h1b, 0.0)) - 1.0)
    else:
        m1 = jnp.where(h1 > 0, h1, jnp.exp(jnp.minimum(h1, 0.0)) - 1.0)
        map1 = m1.astype(jnp.bfloat16)
    map2 = jnp.dot(map1, w2.astype(jnp.bfloat16),
                   preferred_element_type=jnp.float32) + b2
    masked_vec = map2 * mask
    max_vec = jnp.max(masked_vec, axis=1, keepdims=True)
    exps = jnp.exp(masked_vec - max_vec)
    masked_exps = exps * mask
    masked_sums = jnp.sum(masked_exps, axis=1, keepdims=True)
    masked_sums = masked_sums + (masked_sums == 0).astype(jnp.float32)
    soft = masked_exps / (masked_sums + 1e-20)
    return jnp.sum(x_bf.astype(jnp.float32) * soft, axis=1)


# ----------------------------------------------------------------------------
# Self-test
# ----------------------------------------------------------------------------
if __name__ == "__main__":
    key = jax.random.PRNGKey(0)
    B, S, d_hidden = 2, 8, 16
    D = 2 * d_hidden  # fc1/fc2 are Linear(D, D)

    k_x, k_w1, k_w2 = jax.random.split(key, 3)
    inputs = jax.random.normal(k_x, (B, S, D), dtype=jnp.float32)

    # mask: first sample fully valid, second sample valid for 5/8 positions
    rep_mask = jnp.stack([
        jnp.ones((S,), dtype=jnp.float32),
        (jnp.arange(S) < 5).astype(jnp.float32),
    ], axis=0)

    # Deterministic Xavier-uniform init (fan_in = fan_out = D), biases zero.
    bound = (6.0 / (D + D)) ** 0.5
    w1 = jax.random.uniform(k_w1, (D, D), minval=-bound, maxval=bound,
                            dtype=jnp.float32)
    w2 = jax.random.uniform(k_w2, (D, D), minval=-bound, maxval=bound,
                            dtype=jnp.float32)
    b1 = jnp.zeros((D,), dtype=jnp.float32)
    b2 = jnp.zeros((D,), dtype=jnp.float32)

    out = source2token(inputs, rep_mask, w1, b1, w2, b2)
    out = jax.block_until_ready(out)
    assert out.shape == (B, D)

    # Tight check against a reference mirroring the kernel's precision choices
    # (slack covers approx-reciprocal and accumulation-order differences).
    elu_bf = _elu_in_bf16_for_device()
    ref_bf = _reference_bf16(inputs, rep_mask, w1, b1, w2, b2, elu_bf)
    assert jnp.allclose(out, ref_bf, atol=3e-2, rtol=3e-2), (
        f"max abs diff vs bf16 mirror {jnp.max(jnp.abs(out - ref_bf))}")

    # Semantic check against the exact f32 module (bf16-level tolerance).
    ref_32 = _reference_f32(inputs, rep_mask, w1, b1, w2, b2)
    assert jnp.allclose(out, ref_32, atol=8e-2, rtol=8e-2), (
        f"max abs diff vs f32 reference {jnp.max(jnp.abs(out - ref_32))}")

    print("KERNEL_OK")
</pallas_src>

<mosaic_0001>
module attributes {stable_mosaic.version = 11 : i64} {
  func.func @_s2t_kernel(%arg0: i32, %arg1: memref<8x16x128xbf16, #tpu.memory_space<vmem>>, %arg2: memref<8x16x1xf32, #tpu.memory_space<vmem>>, %arg3: memref<128x128xbf16, #tpu.memory_space<vmem>>, %arg4: memref<1x128xf32, #tpu.memory_space<vmem>>, %arg5: memref<128x128xbf16, #tpu.memory_space<vmem>>, %arg6: memref<1x128xf32, #tpu.memory_space<vmem>>, %arg7: memref<8x128xf32, #tpu.memory_space<vmem>>) attributes {dimension_semantics = [#tpu.dimension_semantics<parallel>], iteration_bounds = array<i64: 1>, scalar_prefetch = 0 : i64, scratch_operands = 0 : i64, tpu.core_type = #tpu.core_type<tc>, window_params = [{transform_indices = @transform_0, window_bounds = array<i64: 8, 16, 128>}, {transform_indices = @transform_1, window_bounds = array<i64: 8, 16, 1>}, {pipeline_mode = #tpu.pipeline_mode<synchronous>, transform_indices = @transform_2, window_bounds = array<i64: 128, 128>}, {pipeline_mode = #tpu.pipeline_mode<synchronous>, transform_indices = @transform_3, window_bounds = array<i64: 1, 128>}, {pipeline_mode = #tpu.pipeline_mode<synchronous>, transform_indices = @transform_4, window_bounds = array<i64: 128, 128>}, {pipeline_mode = #tpu.pipeline_mode<synchronous>, transform_indices = @transform_5, window_bounds = array<i64: 1, 128>}, {transform_indices = @transform_6, window_bounds = array<i64: 8, 128>}]} {
    %c0 = arith.constant 0 : index
    %c0_0 = arith.constant 0 : index
    %c0_1 = arith.constant 0 : index
    %0 = vector.load %arg1[%c0, %c0_0, %c0_1] : memref<8x16x128xbf16, #tpu.memory_space<vmem>>, vector<8x16x128xbf16>
    %c0_2 = arith.constant 0 : index
    %c0_3 = arith.constant 0 : index
    %c0_4 = arith.constant 0 : index
    %1 = vector.load %arg2[%c0_2, %c0_3, %c0_4] : memref<8x16x1xf32, #tpu.memory_space<vmem>>, vector<8x16x1xf32>
    %2 = vector.shape_cast %0 : vector<8x16x128xbf16> to vector<128x128xbf16>
    %c0_5 = arith.constant 0 : index
    %c0_6 = arith.constant 0 : index
    %3 = vector.load %arg3[%c0_5, %c0_6] : memref<128x128xbf16, #tpu.memory_space<vmem>>, vector<128x128xbf16>
    %cst = arith.constant dense<0.000000e+00> : vector<128x128xf32>
    %4 = tpu.matmul %2, %3, %cst {dimension_numbers = #tpu.dot_dimension_numbers<[1], [0], [0], [1], [0, 0, 1, 1], [], []>} : vector<128x128xbf16>, vector<128x128xbf16>, vector<128x128xf32> -> vector<128x128xf32>
    %c0_7 = arith.constant 0 : index
    %c0_8 = arith.constant 0 : index
    %5 = vector.load %arg4[%c0_7, %c0_8] : memref<1x128xf32, #tpu.memory_space<vmem>>, vector<1x128xf32>
    %6 = vector.broadcast %5 : vector<1x128xf32> to vector<128x128xf32>
    %7 = arith.addf %4, %6 : vector<128x128xf32>
    %cst_9 = arith.constant 0.000000e+00 : f32
    %8 = vector.broadcast %cst_9 : f32 to vector<128x128xf32>
    %9 = arith.cmpf ogt, %7, %8 : vector<128x128xf32>
    %cst_10 = arith.constant 0.000000e+00 : f32
    %10 = vector.broadcast %cst_10 : f32 to vector<128x128xf32>
    %11 = arith.minimumf %7, %10 : vector<128x128xf32>
    %12 = math.exp %11 : vector<128x128xf32>
    %cst_11 = arith.constant 1.000000e+00 : f32
    %13 = vector.broadcast %cst_11 : f32 to vector<128x128xf32>
    %14 = arith.subf %12, %13 : vector<128x128xf32>
    %15 = arith.select %9, %7, %14 : vector<128x128xi1>, vector<128x128xf32>
    %16 = arith.truncf %15 : vector<128x128xf32> to vector<128x128xbf16>
    %c0_12 = arith.constant 0 : index
    %c0_13 = arith.constant 0 : index
    %17 = vector.load %arg5[%c0_12, %c0_13] : memref<128x128xbf16, #tpu.memory_space<vmem>>, vector<128x128xbf16>
    %cst_14 = arith.constant dense<0.000000e+00> : vector<128x128xf32>
    %18 = tpu.matmul %16, %17, %cst_14 {dimension_numbers = #tpu.dot_dimension_numbers<[1], [0], [0], [1], [0, 0, 1, 1], [], []>} : vector<128x128xbf16>, vector<128x128xbf16>, vector<128x128xf32> -> vector<128x128xf32>
    %c0_15 = arith.constant 0 : index
    %c0_16 = arith.constant 0 : index
    %19 = vector.load %arg6[%c0_15, %c0_16] : memref<1x128xf32, #tpu.memory_space<vmem>>, vector<1x128xf32>
    %20 = vector.broadcast %19 : vector<1x128xf32> to vector<128x128xf32>
    %21 = arith.addf %18, %20 : vector<128x128xf32>
    %22 = vector.shape_cast %21 : vector<128x128xf32> to vector<8x16x128xf32>
    %23 = vector.broadcast %1 : vector<8x16x1xf32> to vector<8x16x128xf32>
    %24 = arith.mulf %22, %23 : vector<8x16x128xf32>
    %cst_17 = arith.constant dense<0xFF800000> : vector<8x128xf32>
    %25 = vector.multi_reduction <maximumf>, %24, %cst_17 [1] : vector<8x16x128xf32> to vector<8x128xf32>
    %26 = vector.shape_cast %25 : vector<8x128xf32> to vector<8x1x128xf32>
    %27 = vector.broadcast %26 : vector<8x1x128xf32> to vector<8x16x128xf32>
    %28 = arith.subf %24, %27 : vector<8x16x128xf32>
    %29 = math.exp %28 : vector<8x16x128xf32>
    %30 = vector.broadcast %1 : vector<8x16x1xf32> to vector<8x16x128xf32>
    %31 = arith.mulf %29, %30 : vector<8x16x128xf32>
    %cst_18 = arith.constant dense<0.000000e+00> : vector<8x128xf32>
    %32 = vector.multi_reduction <add>, %31, %cst_18 [1] : vector<8x16x128xf32> to vector<8x128xf32>
    %cst_19 = arith.constant 0.000000e+00 : f32
    %33 = vector.broadcast %cst_19 : f32 to vector<8x128xf32>
    %34 = arith.cmpf oeq, %32, %33 : vector<8x128xf32>
    %35 = arith.extui %34 : vector<8x128xi1> to vector<8x128xi32>
    %36 = arith.sitofp %35 : vector<8x128xi32> to vector<8x128xf32>
    %37 = arith.addf %32, %36 : vector<8x128xf32>
    %cst_20 = arith.constant 9.99999968E-21 : f32
    %38 = vector.broadcast %cst_20 : f32 to vector<8x128xf32>
    %39 = arith.addf %37, %38 : vector<8x128xf32>
    %40 = tpu.reciprocal %39 {approx = true} : vector<8x128xf32> -> vector<8x128xf32>
    %41 = arith.extf %0 : vector<8x16x128xbf16> to vector<8x16x128xf32>
    %42 = arith.mulf %41, %31 : vector<8x16x128xf32>
    %cst_21 = arith.constant dense<0.000000e+00> : vector<8x128xf32>
    %43 = vector.multi_reduction <add>, %42, %cst_21 [1] : vector<8x16x128xf32> to vector<8x128xf32>
    %44 = arith.mulf %43, %40 : vector<8x128xf32>
    %c0_22 = arith.constant 0 : index
    %c0_23 = arith.constant 0 : index
    %45 = vector.load %arg7[%c0_22, %c0_23] : memref<8x128xf32, #tpu.memory_space<vmem>>, vector<8x128xf32>
    tpu.vector_store %arg7[%c0_22, %c0_23], %44 {strides = array<i32>} : memref<8x128xf32, #tpu.memory_space<vmem>>, vector<8x128xf32>,
    return
  }
  func.func @transform_0(%arg0: i32) -> (i32, i32, i32) {
    %c0_i32 = arith.constant 0 : i32
    %c0_i32_0 = arith.constant 0 : i32
    %c0_i32_1 = arith.constant 0 : i32
    return %arg0, %c0_i32, %c0_i32_0 : i32, i32, i32
  }
  func.func @transform_1(%arg0: i32) -> (i32, i32, i32) {
    %c0_i32 = arith.constant 0 : i32
    %c0_i32_0 = arith.constant 0 : i32
    %c0_i32_1 = arith.constant 0 : i32
    return %arg0, %c0_i32, %c0_i32_0 : i32, i32, i32
  }
  func.func @transform_2(%arg0: i32) -> (i32, i32) {
    %c0_i32 = arith.constant 0 : i32
    %c0_i32_0 = arith.constant 0 : i32
    %c0_i32_1 = arith.constant 0 : i32
    return %c0_i32, %c0_i32_0 : i32, i32
  }
  func.func @transform_3(%arg0: i32) -> (i32, i32) {
    %c0_i32 = arith.constant 0 : i32
    %c0_i32_0 = arith.constant 0 : i32
    %c0_i32_1 = arith.constant 0 : i32
    return %c0_i32, %c0_i32_0 : i32, i32
  }
  func.func @transform_4(%arg0: i32) -> (i32, i32) {
    %c0_i32 = arith.constant 0 : i32
    %c0_i32_0 = arith.constant 0 : i32
    %c0_i32_1 = arith.constant 0 : i32
    return %c0_i32, %c0_i32_0 : i32, i32
  }
  func.func @transform_5(%arg0: i32) -> (i32, i32) {
    %c0_i32 = arith.constant 0 : i32
    %c0_i32_0 = arith.constant 0 : i32
    %c0_i32_1 = arith.constant 0 : i32
    return %c0_i32, %c0_i32_0 : i32, i32
  }
  func.func @transform_6(%arg0: i32) -> (i32, i32) {
    %c0_i32 = arith.constant 0 : i32
    %c0_i32_0 = arith.constant 0 : i32
    return %arg0, %c0_i32 : i32, i32
  }
}

module attributes {stable_mosaic.version = 11 : i64} {
  func.func @_s2t_kernel(%arg0: i32, %arg1: memref<8x16x128xbf16, #tpu.memory_space<vmem>>, %arg2: memref<8x16x1xf32, #tpu.memory_space<vmem>>, %arg3: memref<128x128xbf16, #tpu.memory_space<vmem>>, %arg4: memref<1x128xf32, #tpu.memory_space<vmem>>, %arg5: memref<128x128xbf16, #tpu.memory_space<vmem>>, %arg6: memref<1x128xf32, #tpu.memory_space<vmem>>, %arg7: memref<8x128xf32, #tpu.memory_space<vmem>>) attributes {dimension_semantics = [#tpu.dimension_semantics<parallel>], iteration_bounds = array<i64: 1>, scalar_prefetch = 0 : i64, scratch_operands = 0 : i64, tpu.core_type = #tpu.core_type<tc>, window_params = [{transform_indices = @transform_0, window_bounds = array<i64: 8, 16, 128>}, {transform_indices = @transform_1, window_bounds = array<i64: 8, 16, 1>}, {pipeline_mode = #tpu.pipeline_mode<synchronous>, transform_indices = @transform_2, window_bounds = array<i64: 128, 128>}, {pipeline_mode = #tpu.pipeline_mode<synchronous>, transform_indices = @transform_3, window_bounds = array<i64: 1, 128>}, {pipeline_mode = #tpu.pipeline_mode<synchronous>, transform_indices = @transform_4, window_bounds = array<i64: 128, 128>}, {pipeline_mode = #tpu.pipeline_mode<synchronous>, transform_indices = @transform_5, window_bounds = array<i64: 1, 128>}, {transform_indices = @transform_6, window_bounds = array<i64: 8, 128>}]} {
    %c0 = arith.constant 0 : index
    %c0_0 = arith.constant 0 : index
    %c0_1 = arith.constant 0 : index
    %0 = vector.load %arg1[%c0, %c0_0, %c0_1] : memref<8x16x128xbf16, #tpu.memory_space<vmem>>, vector<8x16x128xbf16>
    %c0_2 = arith.constant 0 : index
    %c0_3 = arith.constant 0 : index
    %c0_4 = arith.constant 0 : index
    %1 = vector.load %arg2[%c0_2, %c0_3, %c0_4] : memref<8x16x1xf32, #tpu.memory_space<vmem>>, vector<8x16x1xf32>
    %2 = vector.shape_cast %0 : vector<8x16x128xbf16> to vector<128x128xbf16>
    %c0_5 = arith.constant 0 : index
    %c0_6 = arith.constant 0 : index
    %3 = vector.load %arg3[%c0_5, %c0_6] : memref<128x128xbf16, #tpu.memory_space<vmem>>, vector<128x128xbf16>
    %cst = arith.constant dense<0.000000e+00> : vector<128x128xf32>
    %4 = tpu.matmul %2, %3, %cst {dimension_numbers = #tpu.dot_dimension_numbers<[1], [0], [0], [1], [0, 0, 1, 1], [], []>} : vector<128x128xbf16>, vector<128x128xbf16>, vector<128x128xf32> -> vector<128x128xf32>
    %c0_7 = arith.constant 0 : index
    %c0_8 = arith.constant 0 : index
    %5 = vector.load %arg4[%c0_7, %c0_8] : memref<1x128xf32, #tpu.memory_space<vmem>>, vector<1x128xf32>
    %6 = vector.broadcast %5 : vector<1x128xf32> to vector<128x128xf32>
    %7 = arith.addf %4, %6 : vector<128x128xf32>
    %cst_9 = arith.constant 0.000000e+00 : f32
    %8 = vector.broadcast %cst_9 : f32 to vector<128x128xf32>
    %9 = arith.cmpf ogt, %7, %8 : vector<128x128xf32>
    %cst_10 = arith.constant 0.000000e+00 : f32
    %10 = vector.broadcast %cst_10 : f32 to vector<128x128xf32>
    %11 = arith.minimumf %7, %10 : vector<128x128xf32>
    %12 = math.exp %11 : vector<128x128xf32>
    %cst_11 = arith.constant 1.000000e+00 : f32
    %13 = vector.broadcast %cst_11 : f32 to vector<128x128xf32>
    %14 = arith.subf %12, %13 : vector<128x128xf32>
    %15 = arith.select %9, %7, %14 : vector<128x128xi1>, vector<128x128xf32>
    %16 = arith.truncf %15 : vector<128x128xf32> to vector<128x128xbf16>
    %c0_12 = arith.constant 0 : index
    %c0_13 = arith.constant 0 : index
    %17 = vector.load %arg5[%c0_12, %c0_13] : memref<128x128xbf16, #tpu.memory_space<vmem>>, vector<128x128xbf16>
    %cst_14 = arith.constant dense<0.000000e+00> : vector<128x128xf32>
    %18 = tpu.matmul %16, %17, %cst_14 {dimension_numbers = #tpu.dot_dimension_numbers<[1], [0], [0], [1], [0, 0, 1, 1], [], []>} : vector<128x128xbf16>, vector<128x128xbf16>, vector<128x128xf32> -> vector<128x128xf32>
    %c0_15 = arith.constant 0 : index
    %c0_16 = arith.constant 0 : index
    %19 = vector.load %arg6[%c0_15, %c0_16] : memref<1x128xf32, #tpu.memory_space<vmem>>, vector<1x128xf32>
    %20 = vector.broadcast %19 : vector<1x128xf32> to vector<128x128xf32>
    %21 = arith.addf %18, %20 : vector<128x128xf32>
    %22 = vector.shape_cast %21 : vector<128x128xf32> to vector<8x16x128xf32>
    %23 = vector.broadcast %1 : vector<8x16x1xf32> to vector<8x16x128xf32>
    %24 = arith.mulf %22, %23 : vector<8x16x128xf32>
    %cst_17 = arith.constant dense<0xFF800000> : vector<8x128xf32>
    %25 = vector.multi_reduction <maximumf>, %24, %cst_17 [1] : vector<8x16x128xf32> to vector<8x128xf32>
    %26 = vector.shape_cast %25 : vector<8x128xf32> to vector<8x1x128xf32>
    %27 = vector.broadcast %26 : vector<8x1x128xf32> to vector<8x16x128xf32>
    %28 = arith.subf %24, %27 : vector<8x16x128xf32>
    %29 = math.exp %28 : vector<8x16x128xf32>
    %30 = vector.broadcast %1 : vector<8x16x1xf32> to vector<8x16x128xf32>
    %31 = arith.mulf %29, %30 : vector<8x16x128xf32>
    %cst_18 = arith.constant dense<0.000000e+00> : vector<8x128xf32>
    %32 = vector.multi_reduction <add>, %31, %cst_18 [1] : vector<8x16x128xf32> to vector<8x128xf32>
    %cst_19 = arith.constant 0.000000e+00 : f32
    %33 = vector.broadcast %cst_19 : f32 to vector<8x128xf32>
    %34 = arith.cmpf oeq, %32, %33 : vector<8x128xf32>
    %35 = arith.extui %34 : vector<8x128xi1> to vector<8x128xi32>
    %36 = arith.sitofp %35 : vector<8x128xi32> to vector<8x128xf32>
    %37 = arith.addf %32, %36 : vector<8x128xf32>
    %cst_20 = arith.constant 9.99999968E-21 : f32
    %38 = vector.broadcast %cst_20 : f32 to vector<8x128xf32>
    %39 = arith.addf %37, %38 : vector<8x128xf32>
    %40 = tpu.reciprocal %39 {approx = true} : vector<8x128xf32> -> vector<8x128xf32>
    %41 = arith.extf %0 : vector<8x16x128xbf16> to vector<8x16x128xf32>
    %42 = arith.mulf %41, %31 : vector<8x16x128xf32>
    %cst_21 = arith.constant dense<0.000000e+00> : vector<8x128xf32>
    %43 = vector.multi_reduction <add>, %42, %cst_21 [1] : vector<8x16x128xf32> to vector<8x128xf32>
    %44 = arith.mulf %43, %40 : vector<8x128xf32>
    %c0_22 = arith.constant 0 : index
    %c0_23 = arith.constant 0 : index
    %45 = vector.load %arg7[%c0_22, %c0_23] : memref<8x128xf32, #tpu.memory_space<vmem>>, vector<8x128xf32>
    tpu.vector_store %arg7[%c0_22, %c0_23], %44 {strides = array<i32>} : memref<8x128xf32, #tpu.memory_space<vmem>>, vector<8x128xf32>,
    return
  }
  func.func @transform_0(%arg0: i32) -> (i32, i32, i32) {
    %c0_i32 = arith.constant 0 : i32
    %c0_i32_0 = arith.constant 0 : i32
    %c0_i32_1 = arith.constant 0 : i32
    return %arg0, %c0_i32, %c0_i32_0 : i32, i32, i32
  }
  func.func @transform_1(%arg0: i32) -> (i32, i32, i32) {
    %c0_i32 = arith.constant 0 : i32
    %c0_i32_0 = arith.constant 0 : i32
    %c0_i32_1 = arith.constant 0 : i32
    return %arg0, %c0_i32, %c0_i32_0 : i32, i32, i32
  }
  func.func @transform_2(%arg0: i32) -> (i32, i32) {
    %c0_i32 = arith.constant 0 : i32
    %c0_i32_0 = arith.constant 0 : i32
    %c0_i32_1 = arith.constant 0 : i32
    return %c0_i32, %c0_i32_0 : i32, i32
  }
  func.func @transform_3(%arg0: i32) -> (i32, i32) {
    %c0_i32 = arith.constant 0 : i32
    %c0_i32_0 = arith.constant 0 : i32
    %c0_i32_1 = arith.constant 0 : i32
    return %c0_i32, %c0_i32_0 : i32, i32
  }
  func.func @transform_4(%arg0: i32) -> (i32, i32) {
    %c0_i32 = arith.constant 0 : i32
    %c0_i32_0 = arith.constant 0 : i32
    %c0_i32_1 = arith.constant 0 : i32
    return %c0_i32, %c0_i32_0 : i32, i32
  }
  func.func @transform_5(%arg0: i32) -> (i32, i32) {
    %c0_i32 = arith.constant 0 : i32
    %c0_i32_0 = arith.constant 0 : i32
    %c0_i32_1 = arith.constant 0 : i32
    return %c0_i32, %c0_i32_0 : i32, i32
  }
  func.func @transform_6(%arg0: i32) -> (i32, i32) {
    %c0_i32 = arith.constant 0 : i32
    %c0_i32_0 = arith.constant 0 : i32
    return %arg0, %c0_i32 : i32, i32
  }
}

</mosaic_0001>

<bundles_post_ra>
// kernel: tpu_custom_call.1
= control target key start
LH: loop header
LB: loop body
LE: loop exit
PB: predicated region body
PF: predicated region fallthrough
CT: control target
= control target key end

     0   :  { %11 = vsyncpa [#allocation3], 0  ;;  %s1634_s0 = inlined_call_operand.vmem [shape: bf16[8,16,128], index: 0, kind: input, shape index: {}]   ;;  %s1635_s1 = inlined_call_operand.vmem [shape: f32[8,16,1], index: 1, kind: input, shape index: {}]   ;;  %s1636_s2 = inlined_call_operand.vmem [shape: bf16[128,128], index: 2, kind: input, shape index: {}]   ;;  %s1637_s3 = inlined_call_operand.vmem [shape: f32[1,128], index: 3, kind: input, shape index: {}]   ;;  %s1638_s4 = inlined_call_operand.hbm [shape: bf16[128,128], index: 4, kind: input, shape index: {}]   ;;  %s1639_s5 = inlined_call_operand.vmem [shape: f32[1,128], index: 5, kind: input, shape index: {}]   ;;  %s1640_s6 = inlined_call_operand.hbm [shape: f32[8,128], index: 6, kind: output, shape index: {}]  }
   0x1   :  { %12 = vsyncpa [#allocation4], 0  ;;  %s25_s23 = sshll.u32 %s1638_s4, 4  ;;  %s1218_s24 = smov [#allocation2]   ;;  %s26_s23 = int_to_ptr.hbm [resolvable:$true] %s25_s23 }
   0x2   :  { %s27_s25 = sshll.u32 %s1218_s24, 4  ;;  %s1219_s26 = smov 64   ;;  %s28_s25 = int_to_ptr.vmem [resolvable:$true] %s27_s25 }
   0x3   :  { %s1220_s27 = smov 4  }
   0x4   :  { %33 = dma.hbm_to_vmem [thread:$0]  %s26_s23, 1024, %s28_s25, [#allocation3], %s1219_s26, %s1219_s26, %s1220_s27  }
   0x5   :  { %1214 = dma.done.wait [#allocation3], 1024  }
   0x6   :  { %1215 = vsyncadd [#allocation3], 4294966272  ;;  %v1050_v0 = vld [vmem:[%s1636_s2 + $0x38] sm:$0xff]  ;;  %v1049_v1 = vld [vmem:[%s1636_s2 + $0x30] sm:$0xff]  ;;  %v1221_v24 = vmov 0   ;;  %s905_s8 = sshll.u32 %s1640_s6, 4  ;;  %s906_s8 = int_to_ptr.hbm [resolvable:$true] %s905_s8 }
   0x7   :  { %188 = vmatpush.bf16.msra.mxu0 %v1050_v0  ;;  %1059 = vmatpush.bf16.msra.mxu2 %v1050_v0  ;;  %v1048_v2 = vld [vmem:[%s1636_s2 + $0x28] sm:$0xff]  ;;  %v1047_v3 = vld [vmem:[%s1636_s2 + $0x20] sm:$0xff]  ;;  %v1046_v4 = vld [vmem:[%s1636_s2 + $0x18] sm:$0xff] }
   0x8   :  { %v1045_v5 = vld [vmem:[%s1636_s2 + $0x10] sm:$0xff]  ;;  %v1044_v6 = vld [vmem:[%s1636_s2 + $0x8] sm:$0xff]  ;;  %v1043_v7 = vld [vmem:[%s1636_s2] sm:$0xff]  ;;  %1081 = vset.pattern.permute.xlu0 %v1221_v24  ;;  %1082 = vset.pattern.permute.xlu1 %v1221_v24 }
   0x9   :  { %v1035_v8 = vld [vmem:[%s1634_s0] sm:$0xff]  ;;  %v1036_v10 = vld [vmem:[%s1634_s0 + $0x8] sm:$0xff]  ;;  %v1058_v12 = vld [vmem:[#allocation2 + $0x38] sm:$0xff]  ;;  %1083 = vset.pattern.permute.xlu2 %v1221_v24 }
   0xa   :  { %v1039_v9 = vld [vmem:[%s1634_s0 + $0x20] sm:$0xff]  ;;  %v1040_v11 = vld [vmem:[%s1634_s0 + $0x28] sm:$0xff]  ;;  %409 = vmatpush.bf16.msra.mxu1 %v1058_v12  ;;  %1067 = vmatpush.bf16.msra.mxu3 %v1058_v12  ;;  %v1037_v13 = vld [vmem:[%s1634_s0 + $0x10] sm:$0xff] }
   0xb   :  { %189 = vmatpush.bf16.msra.mxu0 %v1049_v1  ;;  %1060 = vmatpush.bf16.msra.mxu2 %v1049_v1  ;;  %v1041_v14 = vld [vmem:[%s1634_s0 + $0x30] sm:$0xff]  ;;  %v1038_v15 = vld [vmem:[%s1634_s0 + $0x18] sm:$0xff]  ;;  %v1056_v18 = vld [vmem:[#allocation2 + $0x28] sm:$0xff] }
   0xc   :  { %v1042_v16 = vld [vmem:[%s1634_s0 + $0x38] sm:$0xff]  ;;  %v1057_v17 = vld [vmem:[#allocation2 + $0x30] sm:$0xff]  ;;  %v1055_v19 = vld [vmem:[#allocation2 + $0x20] sm:$0xff] }
   0xd   :  { %v1054_v20 = vld [vmem:[#allocation2 + $0x18] sm:$0xff]  ;;  %v1053_v21 = vld [vmem:[#allocation2 + $0x10] sm:$0xff]  ;;  %v1052_v22 = vld [vmem:[#allocation2 + $0x8] sm:$0xff] }
   0xe   :  { %410 = vmatpush.bf16.msra.mxu1 %v1057_v17  ;;  %1068 = vmatpush.bf16.msra.mxu3 %v1057_v17  ;;  %v1051_v23 = vld [vmem:[#allocation2] sm:$0xff]  ;;  %v57_v30 = vld [vmem:[%s1635_s1 + $0x8] sm:$0xff]  ;;  %v58_v37 = vld [vmem:[%s1635_s1 + $0x10] sm:$0xff] }
   0xf   :  { %190 = vmatpush.bf16.msra.mxu0 %v1048_v2  ;;  %1061 = vmatpush.bf16.msra.mxu2 %v1048_v2  ;;  %v56_v25 = vld [vmem:[%s1635_s1] sm:$0xff]  ;;  %v62_v39 = vld [vmem:[%s1635_s1 + $0x30] sm:$0xff]  ;;  %v59_v48 = vld [vmem:[%s1635_s1 + $0x18] sm:$0xff] }
  0x10   :  { %460 = vperm.xlu0 %1081, %v56_v25   ;;  %v1316_v26 = vld [vmem:[%s1637_s3] ss:$0 sm:$0xff]  ;;  %470 = vperm.xlu1 %1082, %v58_v37   ;;  %v65_v51 = vld [vmem:[%s1635_s1 + $0x48] sm:$0xff]  ;;  %v63_v2 = vld [vmem:[%s1635_s1 + $0x38] sm:$0xff] }
  0x12   :  { %411 = vmatpush.bf16.msra.mxu1 %v1056_v18  ;;  %1069 = vmatpush.bf16.msra.mxu3 %v1056_v18 }
  0x13   :  { %191 = vmatpush.bf16.msra.mxu0 %v1047_v3  ;;  %1062 = vmatpush.bf16.msra.mxu2 %v1047_v3 }
  0x16   :  { %412 = vmatpush.bf16.msra.mxu1 %v1055_v19  ;;  %1070 = vmatpush.bf16.msra.mxu3 %v1055_v19  ;;  %v66_v19 = vld [vmem:[%s1635_s1 + $0x50] sm:$0xff] }
  0x17   :  { %192 = vmatpush.bf16.msra.mxu0 %v1046_v4  ;;  %1063 = vmatpush.bf16.msra.mxu2 %v1046_v4 }
  0x18   :  { %465 = vperm.xlu0 %1081, %v57_v30   ;;  %475 = vperm.xlu1 %1082, %v59_v48  }
  0x1a   :  { %413 = vmatpush.bf16.msra.mxu1 %v1054_v20  ;;  %1071 = vmatpush.bf16.msra.mxu3 %v1054_v20 }
  0x1b   :  { %193 = vmatpush.bf16.msra.mxu0 %v1045_v5  ;;  %1064 = vmatpush.bf16.msra.mxu2 %v1045_v5  ;;  %v60_v5 = vld [vmem:[%s1635_s1 + $0x20] sm:$0xff] }
  0x1c   :  { %480 = vperm.xlu2 %1083, %v60_v5  }
  0x1e   :  { %414 = vmatpush.bf16.msra.mxu1 %v1053_v21  ;;  %1072 = vmatpush.bf16.msra.mxu3 %v1053_v21 }
  0x1f   :  { %194 = vmatpush.bf16.msra.mxu0 %v1044_v6  ;;  %1065 = vmatpush.bf16.msra.mxu2 %v1044_v6  ;;  %v68_v6 = vld [vmem:[%s1635_s1 + $0x60] sm:$0xff] }
  0x20   :  { %490 = vperm.xlu0 %1081, %v62_v39   ;;  %495 = vperm.xlu1 %1082, %v63_v2  }
  0x22   :  { %415 = vmatpush.bf16.msra.mxu1 %v1052_v22  ;;  %1073 = vmatpush.bf16.msra.mxu3 %v1052_v22  ;;  %v61_v22 = vld [vmem:[%s1635_s1 + $0x28] sm:$0xff] }
  0x23   :  { %195 = vmatpush.bf16.msra.mxu0 %v1043_v7  ;;  %1066 = vmatpush.bf16.msra.mxu2 %v1043_v7 }
  0x24   :  { %485 = vperm.xlu2 %1083, %v61_v22  }
  0x26   :  { %196 = vmatmul.bf16.vlgmr.msra.gmra.mxu0 %v1035_v8  ;;  %216 = vmatmul.bf16.vlgmr.msra.gmra.mxu2 %v1039_v9 }
  0x27   :  { %416 = vmatpush.bf16.msra.mxu1 %v1051_v23  ;;  %1074 = vmatpush.bf16.msra.mxu3 %v1051_v23  ;;  %v71_v23 = vld [vmem:[%s1635_s1 + $0x78] sm:$0xff] }
  0x28   :  { %505 = vperm.xlu0 %1081, %v65_v51   ;;  %510 = vperm.xlu1 %1082, %v66_v19  }
  0x30   :  { %520 = vperm.xlu0 %1081, %v68_v6  }
  0x36   :  { %201 = vmatmul.bf16.gmra.mxu0 %v1036_v10  ;;  %221 = vmatmul.bf16.gmra.mxu2 %v1040_v11 }
  0x38   :  { %535 = vperm.xlu0 %1081, %v71_v23  }
  0x46   :  { %206 = vmatmul.bf16.gmra.mxu0 %v1037_v13  ;;  %226 = vmatmul.bf16.gmra.mxu2 %v1041_v14 }
  0x56   :  { %211 = vmatmul.bf16.gmra.mxu0 %v1038_v15  ;;  %231 = vmatmul.bf16.gmra.mxu2 %v1042_v16 }
  0xa3   :  { %v197_v27 = vpop.f32.mrf.mxu0 }
  0xa4   :  { %v198_v28 = vadd.f32 %v1316_v26, %v197_v27 }
  0xa6   :  { %v253_v29 = vmin.f32 %v198_v28, 0.0  ;;  %vm237_vm0 = vcmp.gt.f32.partialorder %v198_v28, 0.0 }
  0xa8   :  { %v269_v32 = vmul.f32 1.442695, %v253_v29 }
  0xa9   :  { %v217_v31 = vpop.f32.mrf.mxu2 }
  0xaa   :  { %v218_v33 = vadd.f32 %v1316_v26, %v217_v31  ;;  %1086 = vpow2.f32 %v269_v32 }
  0xab   :  { %v199_v34 = vpop.f32.mrf.mxu0 }
  0xac   :  { %v261_v35 = vmin.f32 %v218_v33, 0.0  ;;  %v200_v36 = vadd.f32 %v1316_v26, %v199_v34  ;;  %vm245_vm2 = vcmp.gt.f32.partialorder %v218_v33, 0.0 }
  0xae   :  { %v254_v38 = vmin.f32 %v200_v36, 0.0  ;;  %v285_v40 = vmul.f32 1.442695, %v261_v35  ;;  %vm238_vm1 = vcmp.gt.f32.partialorder %v200_v36, 0.0  ;;  %v69_v35 = vld [vmem:[%s1635_s1 + $0x68] sm:$0xff] }
  0xaf   :  { %525 = vperm.xlu1 %1082, %v69_v35   ;;  %v1399_v35 = vpop.permute.xlu0 %460 }
  0xb0   :  { %v271_v41 = vmul.f32 1.442695, %v254_v38  ;;  %v1087_v45 = vpop.eup %1086 }
  0xb1   :  { %v219_v42 = vpop.f32.mrf.mxu2  ;;  %v979_v52 = vadd.f32 -1.0, %v1087_v45 }
  0xb2   :  { %1088 = vpow2.f32 %v271_v41  ;;  %v220_v43 = vadd.f32 %v1316_v26, %v219_v42  ;;  %v64_v42 = vld [vmem:[%s1635_s1 + $0x40] sm:$0xff] }
  0xb3   :  { %v202_v44 = vpop.f32.mrf.mxu0  ;;  %1090 = vpow2.f32 %v285_v40  ;;  %v317_v60 = vsel %vm237_vm0, %v198_v28, %v979_v52  ;;  %500 = vperm.xlu2 %1083, %v64_v42  }
  0xb4   :  { %v262_v46 = vmin.f32 %v220_v43, 0.0  ;;  %v1332_v47 = vadd.f32 %v1316_v26, %v202_v44  ;;  %vm246_vm3 = vcmp.gt.f32.partialorder %v220_v43, 0.0 }
  0xb6   :  { %v287_v49 = vmul.f32 1.442695, %v262_v46  ;;  %v255_v50 = vmin.f32 %v1332_v47, 0.0  ;;  %vm239_vm4 = vcmp.gt.f32.partialorder %v1332_v47, 0.0 }
  0xb8   :  { %v1089_v53 = vpop.eup %1088  ;;  %1092 = vpow2.f32 %v287_v49  ;;  %v273_v57 = vmul.f32 1.442695, %v255_v50 }
  0xb9   :  { %v222_v54 = vpop.f32.mrf.mxu2  ;;  %v980_v55 = vadd.f32 -1.0, %v1089_v53  ;;  %v1091_v56 = vpop.eup %1090 }
  0xba   :  { %v1342_v58 = vadd.f32 %v1316_v26, %v222_v54  ;;  %v987_v1 = vadd.f32 -1.0, %v1091_v56  ;;  %1094 = vpow2.f32 %v273_v57 }
  0xbb   :  { %v204_v59 = vpop.f32.mrf.mxu0  ;;  %v318_v61 = vsel %vm238_vm1, %v200_v36, %v980_v55  ;;  %v67_v55 = vld [vmem:[%s1635_s1 + $0x58] sm:$0xff] }
  0xbc   :  { %v263_v62 = vmin.f32 %v1342_v58, 0.0  ;;  %v205_v63 = vadd.f32 %v1316_v26, %v204_v59  ;;  %v333_v0 = vpack.c.bf16 %v318_v61, %v317_v60  ;;  %v325_v11 = vsel %vm245_vm2, %v218_v33, %v987_v1  ;;  %515 = vperm.xlu2 %1083, %v67_v55  }
  0xbd   :  { %vm247_vm6 = vcmp.gt.f32.partialorder %v1342_v58, 0.0 }
  0xbe   :  { %v1093_v3 = vpop.eup %1092  ;;  %v256_v4 = vmin.f32 %v205_v63, 0.0  ;;  %417 = vmatmul.bf16.vlgmr.msra.gmra.mxu1 %v333_v0  ;;  %v289_v8 = vmul.f32 1.442695, %v263_v62  ;;  %vm240_vm5 = vcmp.gt.f32.partialorder %v205_v63, 0.0 }
  0xbf   :  { %v988_v7 = vadd.f32 -1.0, %v1093_v3 }
  0xc0   :  { %v275_v9 = vmul.f32 1.442695, %v256_v4  ;;  %v1095_v16 = vpop.eup %1094 }
  0xc1   :  { %v224_v10 = vpop.f32.mrf.mxu2  ;;  %v326_v12 = vsel %vm246_vm3, %v220_v43, %v988_v7  ;;  %v981_v24 = vadd.f32 -1.0, %v1095_v16  ;;  %v70_v7 = vld [vmem:[%s1635_s1 + $0x70] sm:$0xff] }
  0xc2   :  { %1096 = vpow2.f32 %v275_v9  ;;  %v225_v13 = vadd.f32 %v1316_v26, %v224_v10  ;;  %v337_v14 = vpack.c.bf16 %v326_v12, %v325_v11 }
  0xc3   :  { %v207_v15 = vpop.f32.mrf.mxu0  ;;  %1098 = vpow2.f32 %v289_v8  ;;  %v319_v33 = vsel %vm239_vm4, %v1332_v47, %v981_v24 }
  0xc4   :  { %v264_v17 = vmin.f32 %v225_v13, 0.0  ;;  %v1357_v18 = vadd.f32 %v1316_v26, %v207_v15  ;;  %437 = vmatmul.bf16.vlgmr.msra.gmra.mxu3 %v337_v14  ;;  %vm248_vm7 = vcmp.gt.f32.partialorder %v225_v13, 0.0  ;;  %530 = vperm.xlu2 %1083, %v70_v7  }
  0xc6   :  { %v291_v20 = vmul.f32 1.442695, %v264_v17  ;;  %v257_v21 = vmin.f32 %v1357_v18, 0.0  ;;  %vm241_vm8 = vcmp.gt.f32.partialorder %v1357_v18, 0.0 }
  0xc8   :  { %v1097_v25 = vpop.eup %1096  ;;  %1100 = vpow2.f32 %v291_v20  ;;  %v277_v30 = vmul.f32 1.442695, %v257_v21 }
  0xc9   :  { %v227_v27 = vpop.f32.mrf.mxu2  ;;  %v982_v28 = vadd.f32 -1.0, %v1097_v25  ;;  %v1099_v29 = vpop.eup %1098 }
  0xca   :  { %v1370_v31 = vadd.f32 %v1316_v26, %v227_v27  ;;  %v989_v39 = vadd.f32 -1.0, %v1099_v29  ;;  %1102 = vpow2.f32 %v277_v30 }
  0xcb   :  { %v209_v32 = vpop.f32.mrf.mxu0  ;;  %v320_v34 = vsel %vm240_vm5, %v205_v63, %v982_v28 }
  0xcc   :  { %v265_v36 = vmin.f32 %v1370_v31, 0.0  ;;  %v210_v37 = vadd.f32 %v1316_v26, %v209_v32  ;;  %v334_v38 = vpack.c.bf16 %v320_v34, %v319_v33  ;;  %v327_v47 = vsel %vm247_vm6, %v1342_v58, %v989_v39  ;;  %v1408_v39 = vld [vmem:[%s1639_s5] ss:$0 sm:$0xff] }
  0xcd   :  { %vm249_vm10 = vcmp.gt.f32.partialorder %v1370_v31, 0.0 }
  0xce   :  { %v1101_v40 = vpop.eup %1100  ;;  %v258_v41 = vmin.f32 %v210_v37, 0.0  ;;  %422 = vmatmul.bf16.gmra.mxu1 %v334_v38  ;;  %v293_v44 = vmul.f32 1.442695, %v265_v36  ;;  %vm242_vm9 = vcmp.gt.f32.partialorder %v210_v37, 0.0  ;;  %v1401_v36 = vpop.permute.xlu2 %480 }
  0xcf   :  { %v990_v43 = vadd.f32 -1.0, %v1101_v40  ;;  %v1403_v38 = vpop.permute.xlu0 %465 }
  0xd0   :  { %v279_v45 = vmul.f32 1.442695, %v258_v41  ;;  %v1103_v52 = vpop.eup %1102  ;;  %v1411_v41 = vpop.permute.xlu1 %470 }
  0xd1   :  { %v229_v46 = vpop.f32.mrf.mxu2  ;;  %v328_v48 = vsel %vm248_vm7, %v225_v13, %v990_v43  ;;  %v983_v59 = vadd.f32 -1.0, %v1103_v52 }
  0xd2   :  { %1104 = vpow2.f32 %v279_v45  ;;  %v230_v49 = vadd.f32 %v1316_v26, %v229_v46  ;;  %v338_v50 = vpack.c.bf16 %v328_v48, %v327_v47 }
  0xd3   :  { %v212_v51 = vpop.f32.mrf.mxu0  ;;  %1106 = vpow2.f32 %v293_v44  ;;  %v321_v2 = vsel %vm241_vm8, %v1357_v18, %v983_v59  ;;  %vm882_vm8 = vcmask 1041409  }
  0xd4   :  { %v266_v53 = vmin.f32 %v230_v49, 0.0  ;;  %v213_v54 = vadd.f32 %v1316_v26, %v212_v51  ;;  %442 = vmatmul.bf16.gmra.mxu3 %v338_v50  ;;  %vm250_vm11 = vcmp.gt.f32.partialorder %v230_v49, 0.0 }
  0xd6   :  { %v295_v56 = vmul.f32 1.442695, %v266_v53  ;;  %v259_v57 = vmin.f32 %v213_v54, 0.0  ;;  %vm243_vm12 = vcmp.gt.f32.partialorder %v213_v54, 0.0  ;;  %v1414_v44 = vpop.permute.xlu2 %485 }
  0xd7   :  { %v1418_v47 = vpop.permute.xlu0 %490 }
  0xd8   :  { %v1105_v58 = vpop.eup %1104  ;;  %1108 = vpow2.f32 %v295_v56  ;;  %v281_v63 = vmul.f32 1.442695, %v259_v57  ;;  %v1420_v53 = vpop.permute.xlu1 %475 }
  0xd9   :  { %v232_v60 = vpop.f32.mrf.mxu2  ;;  %v984_v61 = vadd.f32 -1.0, %v1105_v58  ;;  %v1107_v62 = vpop.eup %1106 }
  0xda   :  { %v233_v0 = vadd.f32 %v1316_v26, %v232_v60  ;;  %v991_v8 = vadd.f32 -1.0, %v1107_v62  ;;  %1110 = vpow2.f32 %v281_v63 }
  0xdb   :  { %v214_v1 = vpop.f32.mrf.mxu0  ;;  %v322_v3 = vsel %vm242_vm9, %v210_v37, %v984_v61  ;;  %vm884_vm9 = vcmask 1042434  }
  0xdc   :  { %v267_v4 = vmin.f32 %v233_v0, 0.0  ;;  %v215_v5 = vadd.f32 %v1316_v26, %v214_v1  ;;  %v335_v6 = vpack.c.bf16 %v322_v3, %v321_v2  ;;  %v329_v15 = vsel %vm249_vm10, %v1370_v31, %v991_v8 }
  0xdd   :  { %vm251_vm14 = vcmp.gt.f32.partialorder %v233_v0, 0.0  ;;  %vm886_vm10 = vcmask 1043459  }
  0xde   :  { %v1109_v9 = vpop.eup %1108  ;;  %v260_v10 = vmin.f32 %v215_v5, 0.0  ;;  %427 = vmatmul.bf16.gmra.mxu1 %v335_v6  ;;  %v297_v12 = vmul.f32 1.442695, %v267_v4  ;;  %vm244_vm13 = vcmp.gt.f32.partialorder %v215_v5, 0.0 }
  0xdf   :  { %v992_v11 = vadd.f32 -1.0, %v1109_v9  ;;  %v1426_v60 = vpop.permute.xlu0 %505 }
  0xe0   :  { %v283_v13 = vmul.f32 1.442695, %v260_v10  ;;  %v1111_v19 = vpop.eup %1110  ;;  %v1433_v7 = vpop.permute.xlu1 %495 }
  0xe1   :  { %v234_v14 = vpop.f32.mrf.mxu2  ;;  %v330_v16 = vsel %vm250_vm11, %v230_v49, %v992_v11  ;;  %v985_v22 = vadd.f32 -1.0, %v1111_v19  ;;  %vm888_vm11 = vcmask 1044484  }
  0xe2   :  { %1112 = vpow2.f32 %v283_v13  ;;  %v235_v17 = vadd.f32 %v1316_v26, %v234_v14  ;;  %v339_v18 = vpack.c.bf16 %v330_v16, %v329_v15 }
  0xe3   :  { %1114 = vpow2.f32 %v297_v12  ;;  %v323_v27 = vsel %vm243_vm12, %v213_v54, %v985_v22  ;;  %vm890_vm12 = vcmask 1045509  }
  0xe4   :  { %v268_v20 = vmin.f32 %v235_v17, 0.0  ;;  %447 = vmatmul.bf16.gmra.mxu3 %v339_v18  ;;  %vm252_vm15 = vcmp.gt.f32.partialorder %v235_v17, 0.0 }
  0xe6   :  { %v299_v21 = vmul.f32 1.442695, %v268_v20 }
  0xe8   :  { %v1113_v23 = vpop.eup %1112  ;;  %1116 = vpow2.f32 %v299_v21 }
  0xe9   :  { %v986_v24 = vadd.f32 -1.0, %v1113_v23  ;;  %v1115_v25 = vpop.eup %1114 }
  0xea   :  { %v993_v30 = vadd.f32 -1.0, %v1115_v25 }
  0xeb   :  { %v324_v28 = vsel %vm244_vm13, %v215_v5, %v986_v24  ;;  %vm892_vm13 = vcmask 1046534  }
  0xec   :  { %v336_v29 = vpack.c.bf16 %v324_v28, %v323_v27  ;;  %v331_v32 = vsel %vm251_vm14, %v233_v0, %v993_v30  ;;  %v1437_v27 = vpop.permute.xlu1 %510  ;;  %vm894_vm14 = vcmask 1047559  }
  0xee   :  { %v1117_v31 = vpop.eup %1116  ;;  %432 = vmatmul.bf16.gmra.mxu1 %v336_v29 }
  0xef   :  { %v994_v26 = vadd.f32 -1.0, %v1117_v31 }
  0xf1   :  { %v332_v33 = vsel %vm252_vm15, %v235_v17, %v994_v26 }
  0xf2   :  { %v340_v34 = vpack.c.bf16 %v332_v33, %v331_v32 }
  0xf4   :  { %452 = vmatmul.bf16.gmra.mxu3 %v340_v34 }
 0x10d   :  { %v1423_v56 = vpop.permute.xlu2 %500 }
 0x116   :  { %v1440_v31 = vpop.permute.xlu2 %515 }
 0x13b   :  { %v418_v37 = vpop.f32.mrf.mxu1 }
 0x13c   :  { %v419_v40 = vadd.f32 %v1408_v39, %v418_v37 }
 0x13e   :  { %v538_v45 = vmul.f32 %v1399_v35, %v419_v40 }
 0x143   :  { %v420_v42 = vpop.f32.mrf.mxu1 }
 0x144   :  { %v421_v43 = vadd.f32 %v1408_v39, %v420_v42 }
 0x146   :  { %v539_v46 = vmul.f32 %v1403_v38, %v421_v43 }
 0x147   :  { %v438_v48 = vpop.f32.mrf.mxu3 }
 0x148   :  { %v554_v49 = vmax.f32 %v538_v45, %v539_v46  ;;  %v439_v55 = vadd.f32 %v1408_v39, %v438_v48 }
 0x14a   :  { %v555_v50 = vrot.slane %v554_v49, 4  ;;  %v546_v62 = vmul.f32 %v1423_v56, %v439_v55 }
 0x14b   :  { %v423_v51 = vpop.f32.mrf.mxu1 }
 0x14c   :  { %v556_v52 = vmax.f32 %v554_v49, %v555_v50  ;;  %v424_v63 = vadd.f32 %v1408_v39, %v423_v51 }
 0x14e   :  { %v557_v54 = vrot.slane %v556_v52, 2  ;;  %v540_v5 = vmul.f32 %v1411_v41, %v424_v63 }
 0x14f   :  { %v440_v57 = vpop.f32.mrf.mxu3 }
 0x150   :  { %v558_v59 = vmax.f32 %v556_v52, %v557_v54  ;;  %v441_v58 = vadd.f32 %v1408_v39, %v440_v57 }
 0x152   :  { %v559_v61 = vrot.slane %v558_v59, 1  ;;  %v547_v0 = vmul.f32 %v1426_v60, %v441_v58 }
 0x153   :  { %v425_v1 = vpop.f32.mrf.mxu1 }
 0x154   :  { %v582_v2 = vmax.f32 %v546_v62, %v547_v0  ;;  %v426_v3 = vadd.f32 %v1408_v39, %v425_v1  ;;  %v560_v4 = vmax.f32 %v558_v59, %v559_v61 }
 0x156   :  { %v583_v6 = vrot.slane %v582_v2, 4  ;;  %v541_v8 = vmul.f32 %v1420_v53, %v426_v3  ;;  %v610_v12 = vsub.f32 %v538_v45, %v560_v4  ;;  %v611_v15 = vsub.f32 %v539_v46, %v560_v4 }
 0x157   :  { %v443_v9 = vpop.f32.mrf.mxu3 }
 0x158   :  { %v584_v10 = vmax.f32 %v582_v2, %v583_v6  ;;  %v561_v11 = vmax.f32 %v540_v5, %v541_v8  ;;  %v626_v19 = vmul.f32 1.442695, %v610_v12  ;;  %v628_v22 = vmul.f32 1.442695, %v611_v15 }
 0x159   :  { %v444_v23 = vadd.f32 %v1408_v39, %v443_v9 }
 0x15a   :  { %v585_v13 = vrot.slane %v584_v10, 2  ;;  %v562_v14 = vrot.slane %v561_v11, 4  ;;  %1118 = vpow2.f32 %v626_v19 }
 0x15b   :  { %v428_v16 = vpop.f32.mrf.mxu1  ;;  %1120 = vpow2.f32 %v628_v22  ;;  %v548_v26 = vmul.f32 %v1437_v27, %v444_v23  ;;  %v1464_v22 = vpop.permute.xlu0 %520 }
 0x15c   :  { %v586_v17 = vmax.f32 %v584_v10, %v585_v13  ;;  %v563_v18 = vmax.f32 %v561_v11, %v562_v14  ;;  %v429_v34 = vadd.f32 %v1408_v39, %v428_v16  ;;  %v1466_v23 = vpop.permute.xlu1 %525 }
 0x15e   :  { %v587_v20 = vrot.slane %v586_v17, 1  ;;  %v564_v21 = vrot.slane %v563_v18, 2  ;;  %v1447_v51 = vmul.f32 %v1401_v36, %v429_v34 }
 0x15f   :  { %v445_v24 = vpop.f32.mrf.mxu3 }
 0x160   :  { %v565_v25 = vmax.f32 %v563_v18, %v564_v21  ;;  %v446_v28 = vadd.f32 %v1408_v39, %v445_v24  ;;  %v588_v29 = vmax.f32 %v586_v17, %v587_v20  ;;  %v1119_v49 = vpop.eup %1118 }
 0x161   :  { %v1121_v54 = vpop.eup %1120  ;;  %v1455_v63 = vmul.f32 %v1119_v49, %v1399_v35 }
 0x162   :  { %v566_v30 = vrot.slane %v565_v25, 1  ;;  %v549_v32 = vmul.f32 %v1440_v31, %v446_v28  ;;  %v618_v43 = vsub.f32 %v546_v62, %v588_v29  ;;  %v619_v45 = vsub.f32 %v547_v0, %v588_v29 }
 0x163   :  { %v430_v33 = vpop.f32.mrf.mxu1  ;;  %v1458_v0 = vmul.f32 %v1121_v54, %v1403_v38 }
 0x164   :  { %v567_v37 = vmax.f32 %v565_v25, %v566_v30  ;;  %v589_v40 = vmax.f32 %v548_v26, %v549_v32  ;;  %v431_v42 = vadd.f32 %v1408_v39, %v430_v33  ;;  %v642_v59 = vmul.f32 1.442695, %v618_v43 }
 0x165   :  { %v644_v61 = vmul.f32 1.442695, %v619_v45  ;;  %v674_v10 = vadd.f32 %v1458_v0, %v1455_v63 }
 0x166   :  { %v590_v46 = vrot.slane %v589_v40, 4  ;;  %v612_v50 = vsub.f32 %v540_v5, %v567_v37  ;;  %v1450_v52 = vmul.f32 %v1414_v44, %v431_v42  ;;  %v613_v55 = vsub.f32 %v541_v8, %v567_v37 }
 0x167   :  { %v448_v48 = vpop.f32.mrf.mxu3  ;;  %1122 = vpow2.f32 %v642_v59  ;;  %v675_v13 = vrot.slane %v674_v10, 4 }
 0x168   :  { %v591_v57 = vmax.f32 %v589_v40, %v590_v46  ;;  %v568_v58 = vmax.f32 %v1447_v51, %v1450_v52  ;;  %v630_v1 = vmul.f32 1.442695, %v612_v50  ;;  %v632_v3 = vmul.f32 1.442695, %v613_v55 }
 0x169   :  { %1124 = vpow2.f32 %v644_v61  ;;  %v449_v15 = vadd.f32 %v1408_v39, %v448_v48  ;;  %v676_v25 = vadd.f32 %v675_v13, %v674_v10 }
 0x16a   :  { %v592_v62 = vrot.slane %v591_v57, 2  ;;  %v569_v2 = vrot.slane %v568_v58, 4  ;;  %1126 = vpow2.f32 %v630_v1 }
 0x16b   :  { %v433_v5 = vpop.f32.mrf.mxu1  ;;  %1128 = vpow2.f32 %v632_v3  ;;  %v1469_v28 = vmul.f32 %v1464_v22, %v449_v15  ;;  %v677_v45 = vrot.slane %v676_v25, 2 }
 0x16c   :  { %v593_v4 = vmax.f32 %v591_v57, %v592_v62  ;;  %v570_v8 = vmax.f32 %v568_v58, %v569_v2  ;;  %v434_v50 = vadd.f32 %v1408_v39, %v433_v5 }
 0x16d   :  { %v1123_v38 = vpop.eup %1122  ;;  %v678_v2 = vadd.f32 %v677_v45, %v676_v25  ;;  %v1536_v25 = vpop.permute.xlu0 %535 }
 0x16e   :  { %v594_v6 = vrot.slane %v593_v4, 1  ;;  %v571_v12 = vrot.slane %v570_v8, 2 }
 0x16f   :  { %v450_v9 = vpop.f32.mrf.mxu3  ;;  %v1125_v17 = vpop.eup %1124  ;;  %v679_v13 = vrot.slane %v678_v2, 1 }
 0x170   :  { %v595_v35 = vmax.f32 %v593_v4, %v594_v6  ;;  %v451_v16 = vadd.f32 %v1408_v39, %v450_v9  ;;  %v1127_v19 = vpop.eup %1126  ;;  %v572_v24 = vmax.f32 %v570_v8, %v571_v12  ;;  %v1516_v9 = vld [vmem:[%s1634_s0 + $0x8] sm:$0xff]  }
 0x171   :  { %v1129_v21 = vpop.eup %1128  ;;  %v1481_v37 = vmul.f32 %v1127_v19, %v1411_v41  ;;  %v1495_v41 = vld [vmem:[%s1634_s0 + $0x20] sm:$0xff]  }
 0x172   :  { %v620_v11 = vsub.f32 %v548_v26, %v595_v35  ;;  %v621_v14 = vsub.f32 %v549_v32, %v595_v35  ;;  %v1472_v29 = vmul.f32 %v1466_v23, %v451_v16  ;;  %v1475_v26 = vmul.f32 %v1123_v38, %v1423_v56  ;;  %v40_v56 = vld [vmem:[%s1634_s0] sm:$0xff]  }
 0x173   :  { %v435_v30 = vpop.f32.mrf.mxu1  ;;  %v1478_v32 = vmul.f32 %v1125_v17, %v1426_v60  ;;  %v573_v33 = vrot.slane %v572_v24, 1  ;;  %v1484_v40 = vmul.f32 %v1129_v21, %v1420_v53  ;;  %v778_v54 = vunpack.c.l.bf16 %v40_v56 }
 0x174   :  { %v646_v18 = vmul.f32 1.442695, %v620_v11  ;;  %v648_v20 = vmul.f32 1.442695, %v621_v14  ;;  %v596_v42 = vmax.f32 %v1469_v28, %v1472_v29  ;;  %v436_v60 = vadd.f32 %v1408_v39, %v435_v30  ;;  %v1530_v14 = vld [vmem:[%s1634_s0 + $0x28] sm:$0xff]  }
 0x175   :  { %v574_v43 = vmax.f32 %v572_v24, %v573_v33  ;;  %v702_v53 = vadd.f32 %v1478_v32, %v1475_v26  ;;  %v779_v55 = vunpack.c.h.bf16 %v40_v56  ;;  %v681_v57 = vadd.f32 %v1484_v40, %v1481_v37 }
 0x176   :  { %1130 = vpow2.f32 %v646_v18  ;;  %v597_v46 = vrot.slane %v596_v42, 4  ;;  %v1505_v62 = vmul.f32 %v1433_v7, %v436_v60  ;;  %v786_v3 = vunpack.c.l.bf16 %v1495_v41 }
 0x177   :  { %v453_v34 = vpop.f32.mrf.mxu3  ;;  %1132 = vpow2.f32 %v648_v20  ;;  %v614_v48 = vsub.f32 %v1447_v51, %v574_v43  ;;  %v615_v49 = vsub.f32 %v1450_v52, %v574_v43  ;;  %v703_v4 = vrot.slane %v702_v53, 4 }
 0x178   :  { %v598_v59 = vmax.f32 %v596_v42, %v597_v46  ;;  %v1509_v52 = vmul.f32 %v1418_v47, %v434_v50  ;;  %v794_v6 = vmul.f32 %v778_v54, %v1455_v63  ;;  %v795_v8 = vmul.f32 %v779_v55, %v1458_v0 }
 0x179   :  { %v634_v61 = vmul.f32 1.442695, %v614_v48  ;;  %v636_v51 = vmul.f32 1.442695, %v615_v49  ;;  %v682_v10 = vrot.slane %v681_v57, 4  ;;  %v787_v0 = vunpack.c.h.bf16 %v1495_v41 }
 0x17a   :  { %v599_v5 = vrot.slane %v598_v59, 2  ;;  %v575_v38 = vmax.f32 %v1509_v52, %v1505_v62  ;;  %v454_v15 = vadd.f32 %v1408_v39, %v453_v34  ;;  %v780_v16 = vunpack.c.l.bf16 %v1516_v9  ;;  %v1541_v34 = vpop.permute.xlu2 %530 }
 0x17b   :  { %1134 = vpow2.f32 %v634_v61  ;;  %v810_v18 = vadd.f32 %v795_v8, %v794_v6  ;;  %v683_v19 = vadd.f32 %v682_v10, %v681_v57  ;;  %v781_v20 = vunpack.c.h.bf16 %v1516_v9 }
 0x17c   :  { %v1131_v58 = vpop.eup %1130  ;;  %1136 = vpow2.f32 %v636_v51  ;;  %v600_v12 = vmax.f32 %v598_v59, %v599_v5  ;;  %v576_v17 = vrot.slane %v575_v38, 4  ;;  %v788_v33 = vunpack.c.l.bf16 %v1530_v14  ;;  %v44_v51 = vld [vmem:[%s1634_s0 + $0x10] sm:$0xff]  }
 0x17d   :  { %v1133_v1 = vpop.eup %1132  ;;  %v1519_v35 = vmul.f32 %v1131_v58, %v1437_v27  ;;  %v704_v27 = vadd.f32 %v703_v4, %v702_v53  ;;  %v680_v60 = vadd.f32 %v679_v13, %v678_v2  ;;  %v1547_v46 = vmul.f32 %v1541_v34, %v454_v15 }
 0x17e   :  { %v1522_v11 = vmul.f32 %v1133_v1, %v1440_v31  ;;  %v601_v31 = vrot.slane %v600_v12, 1  ;;  %v577_v56 = vmax.f32 %v575_v38, %v576_v17  ;;  %v811_v50 = vrot.slane %v810_v18, 4 }
 0x17f   :  { %v455_v63 = vpop.f32.mrf.mxu3  ;;  %v705_v41 = vrot.slane %v704_v27, 2  ;;  %v684_v54 = vrot.slane %v683_v19, 2  ;;  %v802_v1 = vmul.f32 %v786_v3, %v1475_v26  ;;  %vm730_vm0 = vcmp.eq.f32.partialorder %v680_v60, 0.0 }
 0x180   :  { %v456_v21 = vadd.f32 %v1408_v39, %v455_v63  ;;  %v709_v30 = vadd.f32 %v1522_v11, %v1519_v35  ;;  %v602_v42 = vmax.f32 %v600_v12, %v601_v31  ;;  %v578_v55 = vrot.slane %v577_v56, 2 }
 0x181   :  { %v1135_v24 = vpop.eup %1134  ;;  %v789_v5 = vunpack.c.h.bf16 %v1530_v14  ;;  %v812_v9 = vadd.f32 %v811_v50, %v810_v18  ;;  %v685_v10 = vadd.f32 %v684_v54, %v683_v19  ;;  %v782_v38 = vunpack.c.l.bf16 %v44_v51 }
 0x182   :  { %v1137_v43 = vpop.eup %1136  ;;  %v1544_v45 = vmul.f32 %v1135_v24, %v1401_v36  ;;  %v1550_v39 = vmul.f32 %v1536_v25, %v456_v21  ;;  %v622_v48 = vsub.f32 %v1469_v28, %v602_v42  ;;  %v623_v49 = vsub.f32 %v1472_v29, %v602_v42 }
 0x183   :  { %v1553_v53 = vmul.f32 %v1137_v43, %v1414_v44  ;;  %v710_v57 = vrot.slane %v709_v30, 4  ;;  %v803_v44 = vmul.f32 %v787_v0, %v1478_v32  ;;  %v579_v2 = vmax.f32 %v577_v56, %v578_v55 }
 0x184   :  { %v603_v36 = vmax.f32 %v1547_v46, %v1550_v39  ;;  %v650_v58 = vmul.f32 1.442695, %v622_v48  ;;  %v652_v61 = vmul.f32 1.442695, %v623_v49  ;;  %v706_v29 = vadd.f32 %v705_v41, %v704_v27 }
 0x185   :  { %v688_v59 = vadd.f32 %v1553_v53, %v1544_v45  ;;  %v580_v6 = vrot.slane %v579_v2, 1  ;;  %v711_v26 = vadd.f32 %v710_v57, %v709_v30  ;;  %v1222_v32 = vmov 0.0  }
 0x186   :  { %v604_v28 = vrot.slane %v603_v36, 4  ;;  %1138 = vpow2.f32 %v650_v58  ;;  %v1027_v12 = vsel %vm730_vm0, 1.0, %v1222_v32  ;;  %v707_v0 = vrot.slane %v706_v29, 1  ;;  %v46_v58 = vld [vmem:[%s1634_s0 + $0x18] sm:$0xff]  }
 0x187   :  { %v689_v4 = vrot.slane %v688_v59, 4  ;;  %1140 = vpow2.f32 %v652_v61  ;;  %v581_v63 = vmax.f32 %v579_v2, %v580_v6  ;;  %v838_v15 = vadd.f32 %v803_v44, %v802_v1 }
 0x188   :  { %v605_v8 = vmax.f32 %v603_v36, %v604_v28  ;;  %v796_v27 = vmul.f32 %v780_v16, %v1481_v37  ;;  %v797_v31 = vmul.f32 %v781_v20, %v1484_v40  ;;  %v754_v30 = vadd.f32 %v1027_v12, %v680_v60 }
 0x189   :  { %v690_v3 = vadd.f32 %v689_v4, %v688_v59  ;;  %v616_v21 = vsub.f32 %v1509_v52, %v581_v63  ;;  %v617_v18 = vsub.f32 %v1505_v62, %v581_v63  ;;  %v813_v42 = vrot.slane %v812_v9, 2 }
 0x18a   :  { %v606_v13 = vrot.slane %v605_v8, 2  ;;  %v686_v56 = vrot.slane %v685_v10, 1  ;;  %v712_v43 = vrot.slane %v711_v26, 2  ;;  %v1575_v16 = vadd.f32 %v707_v0, %v706_v29  ;;  %v54_v0 = vld [vmem:[%s1634_s0 + $0x38] sm:$0xff]  }
 0x18b   :  { %v691_v17 = vrot.slane %v690_v3, 2  ;;  %v638_v49 = vmul.f32 1.442695, %v616_v21  ;;  %v640_v50 = vmul.f32 1.442695, %v617_v18  ;;  %v839_v40 = vrot.slane %v838_v15, 4 }
 0x18c   :  { %v607_v19 = vmax.f32 %v605_v8, %v606_v13  ;;  %v1139_v24 = vpop.eup %1138  ;;  %v817_v20 = vadd.f32 %v797_v31, %v796_v27  ;;  %v783_v54 = vunpack.c.h.bf16 %v44_v51  ;;  %v1578_v55 = vadd.f32 1e-20, %v754_v30 }
 0x18d   :  { %v1141_v41 = vpop.eup %1140  ;;  %v1573_v48 = vmul.f32 %v1139_v24, %v1464_v22  ;;  %v692_v62 = vadd.f32 %v691_v17, %v690_v3  ;;  %1142 = vpow2.f32 %v638_v49  ;;  %v1580_v36 = vadd.f32 %v813_v42, %v812_v9 }
 0x18e   :  { %v608_v37 = vrot.slane %v607_v19, 1  ;;  %v671_v52 = vmul.f32 %v1141_v41, %v1466_v23  ;;  %v687_v57 = vadd.f32 %v686_v56, %v685_v10  ;;  %v713_v59 = vadd.f32 %v712_v43, %v711_v26 }
 0x18f   :  { %1144 = vpow2.f32 %v640_v50  ;;  %vm734_vm1 = vcmp.eq.f32.partialorder %v1575_v16, 0.0  ;;  %v1589_v1 = vadd.f32 %v839_v40, %v838_v15  ;;  %v818_v44 = vrot.slane %v817_v20, 4 }
 0x190   :  { %v609_v60 = vmax.f32 %v607_v19, %v608_v37  ;;  %v716_v22 = vadd.f32 %v671_v52, %v1573_v48  ;;  %v804_v28 = vmul.f32 %v788_v33, %v1519_v35  ;;  %v693_v29 = vrot.slane %v692_v62, 1 }
 0x191   :  { %v798_v6 = vmul.f32 %v782_v38, %v1544_v45  ;;  %v799_v8 = vmul.f32 %v783_v54, %v1553_v53  ;;  %v784_v9 = vunpack.c.l.bf16 %v46_v58  ;;  %vm731_vm2 = vcmp.eq.f32.partialorder %v687_v57, 0.0 }
 0x192   :  { %v624_v61 = vsub.f32 %v1547_v46, %v609_v60  ;;  %v625_v23 = vsub.f32 %v1550_v39, %v609_v60  ;;  %v717_v2 = vrot.slane %v716_v22, 4  ;;  %v52_v46 = vld [vmem:[%s1634_s0 + $0x30] sm:$0xff]   ;;  %v714_v26 = vrot.slane %v713_v59, 1  ;;  %s1223_s0 = smov [#allocation5]  }
 0x193   :  { %v1143_v10 = vpop.eup %1142  ;;  %v805_v35 = vmul.f32 %v789_v5, %v1522_v11  ;;  %v785_v45 = vunpack.c.h.bf16 %v46_v58  ;;  %v1603_v12 = vadd.f32 %v818_v44, %v817_v20  ;;  %v694_v38 = vadd.f32 %v693_v29, %v692_v62  ;;  %s903_s30 = sshll.u32 %s1223_s0, 4  ;;  %s904_s30 = int_to_ptr.vmem [resolvable:$true] %s903_s30 }
 0x194   :  { %v654_v51 = vmul.f32 1.442695, %v624_v61  ;;  %v656_v4 = vmul.f32 1.442695, %v625_v23  ;;  %v718_v39 = vadd.f32 %v717_v2, %v716_v22  ;;  %v664_v3 = vmul.f32 %v1143_v10, %v1418_v47 }
 0x195   :  { %v1145_v53 = vpop.eup %1144  ;;  %v790_v63 = vunpack.c.l.bf16 %v52_v46  ;;  %v791_v13 = vunpack.c.h.bf16 %v52_v46  ;;  %v824_v15 = vadd.f32 %v799_v8, %v798_v6  ;;  %v1031_v47 = vsel %vm734_vm1, 1.0, %v1222_v32 }
 0x196   :  { %1146 = vpow2.f32 %v654_v51  ;;  %v719_v33 = vrot.slane %v718_v39, 2  ;;  %v665_v11 = vmul.f32 %v1145_v53, %v1433_v7  ;;  %v800_v14 = vmul.f32 %v784_v9, %v664_v3 }
 0x197   :  { %1148 = vpow2.f32 %v656_v4  ;;  %v1028_v5 = vsel %vm731_vm2, 1.0, %v1222_v32  ;;  %v715_v31 = vadd.f32 %v714_v26, %v713_v59  ;;  %v845_v17 = vadd.f32 %v805_v35, %v804_v28 }
 0x198   :  { %v720_v27 = vadd.f32 %v719_v33, %v718_v39  ;;  %v695_v18 = vadd.f32 %v665_v11, %v664_v3  ;;  %v801_v19 = vmul.f32 %v785_v45, %v665_v11  ;;  %v792_v24 = vunpack.c.l.bf16 %v54_v0 }
 0x199   :  { %vm732_vm3 = vcmp.eq.f32.partialorder %v694_v38, 0.0  ;;  %v806_v42 = vmul.f32 %v790_v63, %v1573_v48  ;;  %v807_v56 = vmul.f32 %v791_v13, %v671_v52  ;;  %v793_v7 = vunpack.c.h.bf16 %v54_v0 }
 0x19a   :  { %v721_v21 = vrot.slane %v720_v27, 1  ;;  %v825_v41 = vrot.slane %v824_v15, 4  ;;  %v696_v49 = vrot.slane %v695_v18, 4  ;;  %v831_v50 = vadd.f32 %v801_v19, %v800_v14 }
 0x19b   :  { %v755_v40 = vadd.f32 %v1028_v5, %v687_v57  ;;  %vm735_vm4 = vcmp.eq.f32.partialorder %v715_v31, 0.0  ;;  %v846_v20 = vrot.slane %v845_v17, 4  ;;  %v1029_v54 = vsel %vm732_vm3, 1.0, %v1222_v32 }
 0x19c   :  { %v1147_v30 = vpop.eup %1146  ;;  %v722_v60 = vadd.f32 %v721_v21, %v720_v27  ;;  %v697_v22 = vadd.f32 %v696_v49, %v695_v18  ;;  %v852_v58 = vadd.f32 %v807_v56, %v806_v42  ;;  %v832_v48 = vrot.slane %v831_v50, 4 }
 0x19d   :  { %v1149_v43 = vpop.eup %1148  ;;  %v672_v37 = vmul.f32 %v1147_v30, %v1541_v34  ;;  %1150 = vrcp.f32 %v1578_v55  ;;  %v820_v23 = vrot.slane %v1603_v12, 2  ;;  %v826_v44 = vadd.f32 %v825_v41, %v824_v15 }
 0x19e   :  { %v673_v62 = vmul.f32 %v1149_v43, %v1536_v25  ;;  %v698_v34 = vrot.slane %v697_v22, 2  ;;  %v758_v57 = vadd.f32 %v1031_v47, %v1575_v16  ;;  %v756_v2 = vadd.f32 %v1029_v54, %v694_v38 }
 0x19f   :  { %v808_v59 = vmul.f32 %v792_v24, %v672_v37  ;;  %v763_v29 = vadd.f32 1e-20, %v755_v40  ;;  %vm736_vm5 = vcmp.eq.f32.partialorder %v722_v60, 0.0  ;;  %v1032_v4 = vsel %vm735_vm4, 1.0, %v1222_v32 }
 0x1a0   :  { %v723_v52 = vadd.f32 %v673_v62, %v672_v37  ;;  %v809_v61 = vmul.f32 %v793_v7, %v673_v62  ;;  %v699_v51 = vadd.f32 %v698_v34, %v697_v22  ;;  %v847_v6 = vadd.f32 %v846_v20, %v845_v17 }
 0x1a1   :  { %v853_v8 = vrot.slane %v852_v58, 4  ;;  %v833_v46 = vadd.f32 %v832_v48, %v831_v50  ;;  %v841_v55 = vrot.slane %v1589_v1, 2  ;;  %v827_v9 = vrot.slane %v826_v44, 2 }
 0x1a2   :  { %v724_v28 = vrot.slane %v723_v52, 4  ;;  %v859_v25 = vadd.f32 %v809_v61, %v808_v59  ;;  %v700_v10 = vrot.slane %v699_v51, 1  ;;  %v764_v35 = vadd.f32 1e-20, %v756_v2 }
 0x1a3   :  { %v1033_v33 = vsel %vm736_vm5, 1.0, %v1222_v32  ;;  %v759_v3 = vadd.f32 %v1032_v4, %v715_v31  ;;  %v1151_v45 = vpop.eup %1150  ;;  %v766_v53 = vadd.f32 1e-20, %v758_v57  ;;  %1152 = vrcp.f32 %v763_v29 }
 0x1a4   :  { %v725_v39 = vadd.f32 %v724_v28, %v723_v52  ;;  %v860_v26 = vrot.slane %v859_v25, 4  ;;  %v821_v38 = vadd.f32 %v820_v23, %v1603_v12  ;;  %v701_v63 = vadd.f32 %v700_v10, %v699_v51 }
 0x1a5   :  { %v834_v13 = vrot.slane %v833_v46, 2  ;;  %v848_v15 = vrot.slane %v847_v6, 2  ;;  %v854_v27 = vadd.f32 %v853_v8, %v852_v58  ;;  %v828_v11 = vadd.f32 %v827_v9, %v826_v44 }
 0x1a6   :  { %v726_v16 = vrot.slane %v725_v39, 2  ;;  %vm733_vm6 = vcmp.eq.f32.partialorder %v701_v63, 0.0  ;;  %v760_v14 = vadd.f32 %v1033_v33, %v722_v60  ;;  %v861_v47 = vadd.f32 %v860_v26, %v859_v25 }
 0x1a7   :  { %1154 = vrcp.f32 %v764_v35  ;;  %v1030_v5 = vsel %vm733_vm6, 1.0, %v1222_v32  ;;  %v767_v21 = vadd.f32 1e-20, %v759_v3  ;;  %v815_v31 = vrot.slane %v1580_v36, 1 }
 0x1a8   :  { %v727_v0 = vadd.f32 %v726_v16, %v725_v39  ;;  %v822_v18 = vrot.slane %v821_v38, 1  ;;  %v757_v19 = vadd.f32 %v1030_v5, %v701_v63  ;;  %v842_v12 = vadd.f32 %v841_v55, %v1589_v1 }
 0x1a9   :  { %v835_v24 = vadd.f32 %v834_v13, %v833_v46  ;;  %1156 = vrcp.f32 %v766_v53  ;;  %v855_v42 = vrot.slane %v854_v27, 2  ;;  %v1153_v56 = vpop.eup %1152  ;;  %v829_v7 = vrot.slane %v828_v11, 1 }
 0x1aa   :  { %v728_v17 = vrot.slane %v727_v0, 1  ;;  %v765_v43 = vadd.f32 1e-20, %v757_v19  ;;  %v768_v41 = vadd.f32 1e-20, %v760_v14  ;;  %v862_v49 = vrot.slane %v861_v47, 2 }
 0x1ab   :  { %1158 = vrcp.f32 %v767_v21  ;;  %v849_v50 = vadd.f32 %v848_v15, %v847_v6  ;;  %v816_v37 = vadd.f32 %v815_v31, %v1580_v36  ;;  %v823_v62 = vadd.f32 %v822_v18, %v821_v38 }
 0x1ac   :  { %v729_v30 = vadd.f32 %v728_v17, %v727_v0  ;;  %1160 = vrcp.f32 %v765_v43  ;;  %v836_v54 = vrot.slane %v835_v24, 1  ;;  %v856_v60 = vadd.f32 %v855_v42, %v854_v27 }
 0x1ad   :  { %v1155_v20 = vpop.eup %1154  ;;  %1162 = vrcp.f32 %v768_v41  ;;  %v830_v22 = vadd.f32 %v829_v7, %v828_v11  ;;  %v843_v59 = vrot.slane %v842_v12, 1  ;;  %v863_v58 = vadd.f32 %v862_v49, %v861_v47 }
 0x1ae   :  { %vm737_vm7 = vcmp.eq.f32.partialorder %v729_v30, 0.0  ;;  %v850_v61 = vrot.slane %v849_v50, 1  ;;  %v867_v23 = vmul.f32 %v1153_v56, %v823_v62  ;;  %v866_v44 = vmul.f32 %v1151_v45, %v816_v37 }
 0x1af   :  { %v1034_v40 = vsel %vm737_vm7, 1.0, %v1222_v32  ;;  %v1157_v48 = vpop.eup %1156  ;;  %v868_v34 = vmul.f32 %v1155_v20, %v830_v22  ;;  %v837_v57 = vadd.f32 %v836_v54, %v835_v24  ;;  %v857_v32 = vrot.slane %v856_v60, 1 }
 0x1b0   :  { %v761_v1 = vadd.f32 %v1034_v40, %v729_v30  ;;  %v844_v28 = vadd.f32 %v843_v59, %v842_v12  ;;  %v864_v25 = vrot.slane %v863_v58, 1  ;;  %v851_v29 = vadd.f32 %v850_v61, %v849_v50 }
 0x1b1   :  { %v1159_v36 = vpop.eup %1158  ;;  %v883_v4 = vsel %vm882_vm8, %v867_v23, %v866_v44  ;;  %v858_v39 = vadd.f32 %v857_v32, %v856_v60 }
 0x1b2   :  { %v769_v52 = vadd.f32 1e-20, %v761_v1  ;;  %v1161_v2 = vpop.eup %1160  ;;  %v870_v8 = vmul.f32 %v1157_v48, %v844_v28  ;;  %v885_v46 = vsel %vm884_vm9, %v868_v34, %v883_v4  ;;  %v871_v55 = vmul.f32 %v1159_v36, %v851_v29 }
 0x1b3   :  { %v869_v51 = vmul.f32 %v1161_v2, %v837_v57  ;;  %v1163_v6 = vpop.eup %1162  ;;  %v865_v10 = vadd.f32 %v864_v25, %v863_v58 }
 0x1b4   :  { %1164 = vrcp.f32 %v769_v52  ;;  %v872_v16 = vmul.f32 %v1163_v6, %v858_v39 }
 0x1b5   :  { %v887_v9 = vsel %vm886_vm10, %v869_v51, %v885_v46 }
 0x1b6   :  { %v889_v26 = vsel %vm888_vm11, %v870_v8, %v887_v9 }
 0x1b7   :  { %v891_v33 = vsel %vm890_vm12, %v871_v55, %v889_v26 }
 0x1b8   :  { %v893_v45 = vsel %vm892_vm13, %v872_v16, %v891_v33 }
 0x1ba   :  { %v1165_v35 = vpop.eup %1164 }
 0x1bb   :  { %v873_v3 = vmul.f32 %v1165_v35, %v865_v10 }
 0x1bd   :  { %v895_v53 = vsel %vm894_vm14, %v873_v3, %v893_v45 }
 0x1be   :  { %897 = vst [vmem:[#allocation5] sm:$0xff] %v895_v53 }
 0x1bf   :  { %908 = dma.vmem_to_hbm [thread:$0]  %s904_s30, 128, %s906_s8, [#allocation4]  }
 0x1c0   :  { %1216 = dma.done.wait [#allocation4], 128  }
 0x1c1   :  { %1217 = vsyncadd [#allocation4], 4294967168 }
 0x1c2   :  { %913 = vsyncpa [#allocation3], 1 }
 0x1c3   :  { %914 = vsyncpa [#allocation4], 1 }

// kernel: tpu_custom_call.1
= control target key start
LH: loop header
LB: loop body
LE: loop exit
PB: predicated region body
PF: predicated region fallthrough
CT: control target
= control target key end

     0   :  { %11 = vsyncpa [#allocation3], 0  ;;  %s1634_s0 = inlined_call_operand.vmem [shape: bf16[8,16,128], index: 0, kind: input, shape index: {}]   ;;  %s1635_s1 = inlined_call_operand.vmem [shape: f32[8,16,1], index: 1, kind: input, shape index: {}]   ;;  %s1636_s2 = inlined_call_operand.vmem [shape: bf16[128,128], index: 2, kind: input, shape index: {}]   ;;  %s1637_s3 = inlined_call_operand.vmem [shape: f32[1,128], index: 3, kind: input, shape index: {}]   ;;  %s1638_s4 = inlined_call_operand.hbm [shape: bf16[128,128], index: 4, kind: input, shape index: {}]   ;;  %s1639_s5 = inlined_call_operand.vmem [shape: f32[1,128], index: 5, kind: input, shape index: {}]   ;;  %s1640_s6 = inlined_call_operand.hbm [shape: f32[8,128], index: 6, kind: output, shape index: {}]  }
   0x1   :  { %12 = vsyncpa [#allocation4], 0  ;;  %s25_s23 = sshll.u32 %s1638_s4, 4  ;;  %s1218_s24 = smov [#allocation2]   ;;  %s26_s23 = int_to_ptr.hbm [resolvable:$true] %s25_s23 }
   0x2   :  { %s27_s25 = sshll.u32 %s1218_s24, 4  ;;  %s1219_s26 = smov 64   ;;  %s28_s25 = int_to_ptr.vmem [resolvable:$true] %s27_s25 }
   0x3   :  { %s1220_s27 = smov 4  }
   0x4   :  { %33 = dma.hbm_to_vmem [thread:$0]  %s26_s23, 1024, %s28_s25, [#allocation3], %s1219_s26, %s1219_s26, %s1220_s27  }
   0x5   :  { %1214 = dma.done.wait [#allocation3], 1024  }
   0x6   :  { %1215 = vsyncadd [#allocation3], 4294966272  ;;  %v1050_v0 = vld [vmem:[%s1636_s2 + $0x38] sm:$0xff]  ;;  %v1049_v1 = vld [vmem:[%s1636_s2 + $0x30] sm:$0xff]  ;;  %v1221_v24 = vmov 0   ;;  %s905_s8 = sshll.u32 %s1640_s6, 4  ;;  %s906_s8 = int_to_ptr.hbm [resolvable:$true] %s905_s8 }
   0x7   :  { %188 = vmatpush.bf16.msra.mxu0 %v1050_v0  ;;  %1059 = vmatpush.bf16.msra.mxu2 %v1050_v0  ;;  %v1048_v2 = vld [vmem:[%s1636_s2 + $0x28] sm:$0xff]  ;;  %v1047_v3 = vld [vmem:[%s1636_s2 + $0x20] sm:$0xff]  ;;  %v1046_v4 = vld [vmem:[%s1636_s2 + $0x18] sm:$0xff] }
   0x8   :  { %v1045_v5 = vld [vmem:[%s1636_s2 + $0x10] sm:$0xff]  ;;  %v1044_v6 = vld [vmem:[%s1636_s2 + $0x8] sm:$0xff]  ;;  %v1043_v7 = vld [vmem:[%s1636_s2] sm:$0xff]  ;;  %1081 = vset.pattern.permute.xlu0 %v1221_v24  ;;  %1082 = vset.pattern.permute.xlu1 %v1221_v24 }
   0x9   :  { %v1035_v8 = vld [vmem:[%s1634_s0] sm:$0xff]  ;;  %v1036_v10 = vld [vmem:[%s1634_s0 + $0x8] sm:$0xff]  ;;  %v1058_v12 = vld [vmem:[#allocation2 + $0x38] sm:$0xff]  ;;  %1083 = vset.pattern.permute.xlu2 %v1221_v24 }
   0xa   :  { %v1039_v9 = vld [vmem:[%s1634_s0 + $0x20] sm:$0xff]  ;;  %v1040_v11 = vld [vmem:[%s1634_s0 + $0x28] sm:$0xff]  ;;  %409 = vmatpush.bf16.msra.mxu1 %v1058_v12  ;;  %1067 = vmatpush.bf16.msra.mxu3 %v1058_v12  ;;  %v1037_v13 = vld [vmem:[%s1634_s0 + $0x10] sm:$0xff] }
   0xb   :  { %189 = vmatpush.bf16.msra.mxu0 %v1049_v1  ;;  %1060 = vmatpush.bf16.msra.mxu2 %v1049_v1  ;;  %v1041_v14 = vld [vmem:[%s1634_s0 + $0x30] sm:$0xff]  ;;  %v1038_v15 = vld [vmem:[%s1634_s0 + $0x18] sm:$0xff]  ;;  %v1056_v18 = vld [vmem:[#allocation2 + $0x28] sm:$0xff] }
   0xc   :  { %v1042_v16 = vld [vmem:[%s1634_s0 + $0x38] sm:$0xff]  ;;  %v1057_v17 = vld [vmem:[#allocation2 + $0x30] sm:$0xff]  ;;  %v1055_v19 = vld [vmem:[#allocation2 + $0x20] sm:$0xff] }
   0xd   :  { %v1054_v20 = vld [vmem:[#allocation2 + $0x18] sm:$0xff]  ;;  %v1053_v21 = vld [vmem:[#allocation2 + $0x10] sm:$0xff]  ;;  %v1052_v22 = vld [vmem:[#allocation2 + $0x8] sm:$0xff] }
   0xe   :  { %410 = vmatpush.bf16.msra.mxu1 %v1057_v17  ;;  %1068 = vmatpush.bf16.msra.mxu3 %v1057_v17  ;;  %v1051_v23 = vld [vmem:[#allocation2] sm:$0xff]  ;;  %v57_v30 = vld [vmem:[%s1635_s1 + $0x8] sm:$0xff]  ;;  %v58_v37 = vld [vmem:[%s1635_s1 + $0x10] sm:$0xff] }
   0xf   :  { %190 = vmatpush.bf16.msra.mxu0 %v1048_v2  ;;  %1061 = vmatpush.bf16.msra.mxu2 %v1048_v2  ;;  %v56_v25 = vld [vmem:[%s1635_s1] sm:$0xff]  ;;  %v62_v39 = vld [vmem:[%s1635_s1 + $0x30] sm:$0xff]  ;;  %v59_v48 = vld [vmem:[%s1635_s1 + $0x18] sm:$0xff] }
  0x10   :  { %460 = vperm.xlu0 %1081, %v56_v25   ;;  %v1316_v26 = vld [vmem:[%s1637_s3] ss:$0 sm:$0xff]  ;;  %470 = vperm.xlu1 %1082, %v58_v37   ;;  %v65_v51 = vld [vmem:[%s1635_s1 + $0x48] sm:$0xff]  ;;  %v63_v2 = vld [vmem:[%s1635_s1 + $0x38] sm:$0xff] }
  0x12   :  { %411 = vmatpush.bf16.msra.mxu1 %v1056_v18  ;;  %1069 = vmatpush.bf16.msra.mxu3 %v1056_v18 }
  0x13   :  { %191 = vmatpush.bf16.msra.mxu0 %v1047_v3  ;;  %1062 = vmatpush.bf16.msra.mxu2 %v1047_v3 }
  0x16   :  { %412 = vmatpush.bf16.msra.mxu1 %v1055_v19  ;;  %1070 = vmatpush.bf16.msra.mxu3 %v1055_v19  ;;  %v66_v19 = vld [vmem:[%s1635_s1 + $0x50] sm:$0xff] }
  0x17   :  { %192 = vmatpush.bf16.msra.mxu0 %v1046_v4  ;;  %1063 = vmatpush.bf16.msra.mxu2 %v1046_v4 }
  0x18   :  { %465 = vperm.xlu0 %1081, %v57_v30   ;;  %475 = vperm.xlu1 %1082, %v59_v48  }
  0x1a   :  { %413 = vmatpush.bf16.msra.mxu1 %v1054_v20  ;;  %1071 = vmatpush.bf16.msra.mxu3 %v1054_v20 }
  0x1b   :  { %193 = vmatpush.bf16.msra.mxu0 %v1045_v5  ;;  %1064 = vmatpush.bf16.msra.mxu2 %v1045_v5  ;;  %v60_v5 = vld [vmem:[%s1635_s1 + $0x20] sm:$0xff] }
  0x1c   :  { %480 = vperm.xlu2 %1083, %v60_v5  }
  0x1e   :  { %414 = vmatpush.bf16.msra.mxu1 %v1053_v21  ;;  %1072 = vmatpush.bf16.msra.mxu3 %v1053_v21 }
  0x1f   :  { %194 = vmatpush.bf16.msra.mxu0 %v1044_v6  ;;  %1065 = vmatpush.bf16.msra.mxu2 %v1044_v6  ;;  %v68_v6 = vld [vmem:[%s1635_s1 + $0x60] sm:$0xff] }
  0x20   :  { %490 = vperm.xlu0 %1081, %v62_v39   ;;  %495 = vperm.xlu1 %1082, %v63_v2  }
  0x22   :  { %415 = vmatpush.bf16.msra.mxu1 %v1052_v22  ;;  %1073 = vmatpush.bf16.msra.mxu3 %v1052_v22  ;;  %v61_v22 = vld [vmem:[%s1635_s1 + $0x28] sm:$0xff] }
  0x23   :  { %195 = vmatpush.bf16.msra.mxu0 %v1043_v7  ;;  %1066 = vmatpush.bf16.msra.mxu2 %v1043_v7 }
  0x24   :  { %485 = vperm.xlu2 %1083, %v61_v22  }
  0x26   :  { %196 = vmatmul.bf16.vlgmr.msra.gmra.mxu0 %v1035_v8  ;;  %216 = vmatmul.bf16.vlgmr.msra.gmra.mxu2 %v1039_v9 }
  0x27   :  { %416 = vmatpush.bf16.msra.mxu1 %v1051_v23  ;;  %1074 = vmatpush.bf16.msra.mxu3 %v1051_v23  ;;  %v71_v23 = vld [vmem:[%s1635_s1 + $0x78] sm:$0xff] }
  0x28   :  { %505 = vperm.xlu0 %1081, %v65_v51   ;;  %510 = vperm.xlu1 %1082, %v66_v19  }
  0x30   :  { %520 = vperm.xlu0 %1081, %v68_v6  }
  0x36   :  { %201 = vmatmul.bf16.gmra.mxu0 %v1036_v10  ;;  %221 = vmatmul.bf16.gmra.mxu2 %v1040_v11 }
  0x38   :  { %535 = vperm.xlu0 %1081, %v71_v23  }
  0x46   :  { %206 = vmatmul.bf16.gmra.mxu0 %v1037_v13  ;;  %226 = vmatmul.bf16.gmra.mxu2 %v1041_v14 }
  0x56   :  { %211 = vmatmul.bf16.gmra.mxu0 %v1038_v15  ;;  %231 = vmatmul.bf16.gmra.mxu2 %v1042_v16 }
  0xa3   :  { %v197_v27 = vpop.f32.mrf.mxu0 }
  0xa4   :  { %v198_v28 = vadd.f32 %v1316_v26, %v197_v27 }
  0xa6   :  { %v253_v29 = vmin.f32 %v198_v28, 0.0  ;;  %vm237_vm0 = vcmp.gt.f32.partialorder %v198_v28, 0.0 }
  0xa8   :  { %v269_v32 = vmul.f32 1.442695, %v253_v29 }
  0xa9   :  { %v217_v31 = vpop.f32.mrf.mxu2 }
  0xaa   :  { %v218_v33 = vadd.f32 %v1316_v26, %v217_v31  ;;  %1086 = vpow2.f32 %v269_v32 }
  0xab   :  { %v199_v34 = vpop.f32.mrf.mxu0 }
  0xac   :  { %v261_v35 = vmin.f32 %v218_v33, 0.0  ;;  %v200_v36 = vadd.f32 %v1316_v26, %v199_v34  ;;  %vm245_vm2 = vcmp.gt.f32.partialorder %v218_v33, 0.0 }
  0xae   :  { %v254_v38 = vmin.f32 %v200_v36, 0.0  ;;  %v285_v40 = vmul.f32 1.442695, %v261_v35  ;;  %vm238_vm1 = vcmp.gt.f32.partialorder %v200_v36, 0.0  ;;  %v69_v35 = vld [vmem:[%s1635_s1 + $0x68] sm:$0xff] }
  0xaf   :  { %525 = vperm.xlu1 %1082, %v69_v35   ;;  %v1399_v35 = vpop.permute.xlu0 %460 }
  0xb0   :  { %v271_v41 = vmul.f32 1.442695, %v254_v38  ;;  %v1087_v45 = vpop.eup %1086 }
  0xb1   :  { %v219_v42 = vpop.f32.mrf.mxu2  ;;  %v979_v52 = vadd.f32 -1.0, %v1087_v45 }
  0xb2   :  { %1088 = vpow2.f32 %v271_v41  ;;  %v220_v43 = vadd.f32 %v1316_v26, %v219_v42  ;;  %v64_v42 = vld [vmem:[%s1635_s1 + $0x40] sm:$0xff] }
  0xb3   :  { %v202_v44 = vpop.f32.mrf.mxu0  ;;  %1090 = vpow2.f32 %v285_v40  ;;  %v317_v60 = vsel %vm237_vm0, %v198_v28, %v979_v52  ;;  %500 = vperm.xlu2 %1083, %v64_v42  }
  0xb4   :  { %v262_v46 = vmin.f32 %v220_v43, 0.0  ;;  %v1332_v47 = vadd.f32 %v1316_v26, %v202_v44  ;;  %vm246_vm3 = vcmp.gt.f32.partialorder %v220_v43, 0.0 }
  0xb6   :  { %v287_v49 = vmul.f32 1.442695, %v262_v46  ;;  %v255_v50 = vmin.f32 %v1332_v47, 0.0  ;;  %vm239_vm4 = vcmp.gt.f32.partialorder %v1332_v47, 0.0 }
  0xb8   :  { %v1089_v53 = vpop.eup %1088  ;;  %1092 = vpow2.f32 %v287_v49  ;;  %v273_v57 = vmul.f32 1.442695, %v255_v50 }
  0xb9   :  { %v222_v54 = vpop.f32.mrf.mxu2  ;;  %v980_v55 = vadd.f32 -1.0, %v1089_v53  ;;  %v1091_v56 = vpop.eup %1090 }
  0xba   :  { %v1342_v58 = vadd.f32 %v1316_v26, %v222_v54  ;;  %v987_v1 = vadd.f32 -1.0, %v1091_v56  ;;  %1094 = vpow2.f32 %v273_v57 }
  0xbb   :  { %v204_v59 = vpop.f32.mrf.mxu0  ;;  %v318_v61 = vsel %vm238_vm1, %v200_v36, %v980_v55  ;;  %v67_v55 = vld [vmem:[%s1635_s1 + $0x58] sm:$0xff] }
  0xbc   :  { %v263_v62 = vmin.f32 %v1342_v58, 0.0  ;;  %v205_v63 = vadd.f32 %v1316_v26, %v204_v59  ;;  %v333_v0 = vpack.c.bf16 %v318_v61, %v317_v60  ;;  %v325_v11 = vsel %vm245_vm2, %v218_v33, %v987_v1  ;;  %515 = vperm.xlu2 %1083, %v67_v55  }
  0xbd   :  { %vm247_vm6 = vcmp.gt.f32.partialorder %v1342_v58, 0.0 }
  0xbe   :  { %v1093_v3 = vpop.eup %1092  ;;  %v256_v4 = vmin.f32 %v205_v63, 0.0  ;;  %417 = vmatmul.bf16.vlgmr.msra.gmra.mxu1 %v333_v0  ;;  %v289_v8 = vmul.f32 1.442695, %v263_v62  ;;  %vm240_vm5 = vcmp.gt.f32.partialorder %v205_v63, 0.0 }
  0xbf   :  { %v988_v7 = vadd.f32 -1.0, %v1093_v3 }
  0xc0   :  { %v275_v9 = vmul.f32 1.442695, %v256_v4  ;;  %v1095_v16 = vpop.eup %1094 }
  0xc1   :  { %v224_v10 = vpop.f32.mrf.mxu2  ;;  %v326_v12 = vsel %vm246_vm3, %v220_v43, %v988_v7  ;;  %v981_v24 = vadd.f32 -1.0, %v1095_v16  ;;  %v70_v7 = vld [vmem:[%s1635_s1 + $0x70] sm:$0xff] }
  0xc2   :  { %1096 = vpow2.f32 %v275_v9  ;;  %v225_v13 = vadd.f32 %v1316_v26, %v224_v10  ;;  %v337_v14 = vpack.c.bf16 %v326_v12, %v325_v11 }
  0xc3   :  { %v207_v15 = vpop.f32.mrf.mxu0  ;;  %1098 = vpow2.f32 %v289_v8  ;;  %v319_v33 = vsel %vm239_vm4, %v1332_v47, %v981_v24 }
  0xc4   :  { %v264_v17 = vmin.f32 %v225_v13, 0.0  ;;  %v1357_v18 = vadd.f32 %v1316_v26, %v207_v15  ;;  %437 = vmatmul.bf16.vlgmr.msra.gmra.mxu3 %v337_v14  ;;  %vm248_vm7 = vcmp.gt.f32.partialorder %v225_v13, 0.0  ;;  %530 = vperm.xlu2 %1083, %v70_v7  }
  0xc6   :  { %v291_v20 = vmul.f32 1.442695, %v264_v17  ;;  %v257_v21 = vmin.f32 %v1357_v18, 0.0  ;;  %vm241_vm8 = vcmp.gt.f32.partialorder %v1357_v18, 0.0 }
  0xc8   :  { %v1097_v25 = vpop.eup %1096  ;;  %1100 = vpow2.f32 %v291_v20  ;;  %v277_v30 = vmul.f32 1.442695, %v257_v21 }
  0xc9   :  { %v227_v27 = vpop.f32.mrf.mxu2  ;;  %v982_v28 = vadd.f32 -1.0, %v1097_v25  ;;  %v1099_v29 = vpop.eup %1098 }
  0xca   :  { %v1370_v31 = vadd.f32 %v1316_v26, %v227_v27  ;;  %v989_v39 = vadd.f32 -1.0, %v1099_v29  ;;  %1102 = vpow2.f32 %v277_v30 }
  0xcb   :  { %v209_v32 = vpop.f32.mrf.mxu0  ;;  %v320_v34 = vsel %vm240_vm5, %v205_v63, %v982_v28 }
  0xcc   :  { %v265_v36 = vmin.f32 %v1370_v31, 0.0  ;;  %v210_v37 = vadd.f32 %v1316_v26, %v209_v32  ;;  %v334_v38 = vpack.c.bf16 %v320_v34, %v319_v33  ;;  %v327_v47 = vsel %vm247_vm6, %v1342_v58, %v989_v39  ;;  %v1408_v39 = vld [vmem:[%s1639_s5] ss:$0 sm:$0xff] }
  0xcd   :  { %vm249_vm10 = vcmp.gt.f32.partialorder %v1370_v31, 0.0 }
  0xce   :  { %v1101_v40 = vpop.eup %1100  ;;  %v258_v41 = vmin.f32 %v210_v37, 0.0  ;;  %422 = vmatmul.bf16.gmra.mxu1 %v334_v38  ;;  %v293_v44 = vmul.f32 1.442695, %v265_v36  ;;  %vm242_vm9 = vcmp.gt.f32.partialorder %v210_v37, 0.0  ;;  %v1401_v36 = vpop.permute.xlu2 %480 }
  0xcf   :  { %v990_v43 = vadd.f32 -1.0, %v1101_v40  ;;  %v1403_v38 = vpop.permute.xlu0 %465 }
  0xd0   :  { %v279_v45 = vmul.f32 1.442695, %v258_v41  ;;  %v1103_v52 = vpop.eup %1102  ;;  %v1411_v41 = vpop.permute.xlu1 %470 }
  0xd1   :  { %v229_v46 = vpop.f32.mrf.mxu2  ;;  %v328_v48 = vsel %vm248_vm7, %v225_v13, %v990_v43  ;;  %v983_v59 = vadd.f32 -1.0, %v1103_v52 }
  0xd2   :  { %1104 = vpow2.f32 %v279_v45  ;;  %v230_v49 = vadd.f32 %v1316_v26, %v229_v46  ;;  %v338_v50 = vpack.c.bf16 %v328_v48, %v327_v47 }
  0xd3   :  { %v212_v51 = vpop.f32.mrf.mxu0  ;;  %1106 = vpow2.f32 %v293_v44  ;;  %v321_v2 = vsel %vm241_vm8, %v1357_v18, %v983_v59  ;;  %vm882_vm8 = vcmask 1041409  }
  0xd4   :  { %v266_v53 = vmin.f32 %v230_v49, 0.0  ;;  %v213_v54 = vadd.f32 %v1316_v26, %v212_v51  ;;  %442 = vmatmul.bf16.gmra.mxu3 %v338_v50  ;;  %vm250_vm11 = vcmp.gt.f32.partialorder %v230_v49, 0.0 }
  0xd6   :  { %v295_v56 = vmul.f32 1.442695, %v266_v53  ;;  %v259_v57 = vmin.f32 %v213_v54, 0.0  ;;  %vm243_vm12 = vcmp.gt.f32.partialorder %v213_v54, 0.0  ;;  %v1414_v44 = vpop.permute.xlu2 %485 }
  0xd7   :  { %v1418_v47 = vpop.permute.xlu0 %490 }
  0xd8   :  { %v1105_v58 = vpop.eup %1104  ;;  %1108 = vpow2.f32 %v295_v56  ;;  %v281_v63 = vmul.f32 1.442695, %v259_v57  ;;  %v1420_v53 = vpop.permute.xlu1 %475 }
  0xd9   :  { %v232_v60 = vpop.f32.mrf.mxu2  ;;  %v984_v61 = vadd.f32 -1.0, %v1105_v58  ;;  %v1107_v62 = vpop.eup %1106 }
  0xda   :  { %v233_v0 = vadd.f32 %v1316_v26, %v232_v60  ;;  %v991_v8 = vadd.f32 -1.0, %v1107_v62  ;;  %1110 = vpow2.f32 %v281_v63 }
  0xdb   :  { %v214_v1 = vpop.f32.mrf.mxu0  ;;  %v322_v3 = vsel %vm242_vm9, %v210_v37, %v984_v61  ;;  %vm884_vm9 = vcmask 1042434  }
  0xdc   :  { %v267_v4 = vmin.f32 %v233_v0, 0.0  ;;  %v215_v5 = vadd.f32 %v1316_v26, %v214_v1  ;;  %v335_v6 = vpack.c.bf16 %v322_v3, %v321_v2  ;;  %v329_v15 = vsel %vm249_vm10, %v1370_v31, %v991_v8 }
  0xdd   :  { %vm251_vm14 = vcmp.gt.f32.partialorder %v233_v0, 0.0  ;;  %vm886_vm10 = vcmask 1043459  }
  0xde   :  { %v1109_v9 = vpop.eup %1108  ;;  %v260_v10 = vmin.f32 %v215_v5, 0.0  ;;  %427 = vmatmul.bf16.gmra.mxu1 %v335_v6  ;;  %v297_v12 = vmul.f32 1.442695, %v267_v4  ;;  %vm244_vm13 = vcmp.gt.f32.partialorder %v215_v5, 0.0 }
  0xdf   :  { %v992_v11 = vadd.f32 -1.0, %v1109_v9  ;;  %v1426_v60 = vpop.permute.xlu0 %505 }
  0xe0   :  { %v283_v13 = vmul.f32 1.442695, %v260_v10  ;;  %v1111_v19 = vpop.eup %1110  ;;  %v1433_v7 = vpop.permute.xlu1 %495 }
  0xe1   :  { %v234_v14 = vpop.f32.mrf.mxu2  ;;  %v330_v16 = vsel %vm250_vm11, %v230_v49, %v992_v11  ;;  %v985_v22 = vadd.f32 -1.0, %v1111_v19  ;;  %vm888_vm11 = vcmask 1044484  }
  0xe2   :  { %1112 = vpow2.f32 %v283_v13  ;;  %v235_v17 = vadd.f32 %v1316_v26, %v234_v14  ;;  %v339_v18 = vpack.c.bf16 %v330_v16, %v329_v15 }
  0xe3   :  { %1114 = vpow2.f32 %v297_v12  ;;  %v323_v27 = vsel %vm243_vm12, %v213_v54, %v985_v22  ;;  %vm890_vm12 = vcmask 1045509  }
  0xe4   :  { %v268_v20 = vmin.f32 %v235_v17, 0.0  ;;  %447 = vmatmul.bf16.gmra.mxu3 %v339_v18  ;;  %vm252_vm15 = vcmp.gt.f32.partialorder %v235_v17, 0.0 }
  0xe6   :  { %v299_v21 = vmul.f32 1.442695, %v268_v20 }
  0xe8   :  { %v1113_v23 = vpop.eup %1112  ;;  %1116 = vpow2.f32 %v299_v21 }
  0xe9   :  { %v986_v24 = vadd.f32 -1.0, %v1113_v23  ;;  %v1115_v25 = vpop.eup %1114 }
  0xea   :  { %v993_v30 = vadd.f32 -1.0, %v1115_v25 }
  0xeb   :  { %v324_v28 = vsel %vm244_vm13, %v215_v5, %v986_v24  ;;  %vm892_vm13 = vcmask 1046534  }
  0xec   :  { %v336_v29 = vpack.c.bf16 %v324_v28, %v323_v27  ;;  %v331_v32 = vsel %vm251_vm14, %v233_v0, %v993_v30  ;;  %v1437_v27 = vpop.permute.xlu1 %510  ;;  %vm894_vm14 = vcmask 1047559  }
  0xee   :  { %v1117_v31 = vpop.eup %1116  ;;  %432 = vmatmul.bf16.gmra.mxu1 %v336_v29 }
  0xef   :  { %v994_v26 = vadd.f32 -1.0, %v1117_v31 }
  0xf1   :  { %v332_v33 = vsel %vm252_vm15, %v235_v17, %v994_v26 }
  0xf2   :  { %v340_v34 = vpack.c.bf16 %v332_v33, %v331_v32 }
  0xf4   :  { %452 = vmatmul.bf16.gmra.mxu3 %v340_v34 }
 0x10d   :  { %v1423_v56 = vpop.permute.xlu2 %500 }
 0x116   :  { %v1440_v31 = vpop.permute.xlu2 %515 }
 0x13b   :  { %v418_v37 = vpop.f32.mrf.mxu1 }
 0x13c   :  { %v419_v40 = vadd.f32 %v1408_v39, %v418_v37 }
 0x13e   :  { %v538_v45 = vmul.f32 %v1399_v35, %v419_v40 }
 0x143   :  { %v420_v42 = vpop.f32.mrf.mxu1 }
 0x144   :  { %v421_v43 = vadd.f32 %v1408_v39, %v420_v42 }
 0x146   :  { %v539_v46 = vmul.f32 %v1403_v38, %v421_v43 }
 0x147   :  { %v438_v48 = vpop.f32.mrf.mxu3 }
 0x148   :  { %v554_v49 = vmax.f32 %v538_v45, %v539_v46  ;;  %v439_v55 = vadd.f32 %v1408_v39, %v438_v48 }
 0x14a   :  { %v555_v50 = vrot.slane %v554_v49, 4  ;;  %v546_v62 = vmul.f32 %v1423_v56, %v439_v55 }
 0x14b   :  { %v423_v51 = vpop.f32.mrf.mxu1 }
 0x14c   :  { %v556_v52 = vmax.f32 %v554_v49, %v555_v50  ;;  %v424_v63 = vadd.f32 %v1408_v39, %v423_v51 }
 0x14e   :  { %v557_v54 = vrot.slane %v556_v52, 2  ;;  %v540_v5 = vmul.f32 %v1411_v41, %v424_v63 }
 0x14f   :  { %v440_v57 = vpop.f32.mrf.mxu3 }
 0x150   :  { %v558_v59 = vmax.f32 %v556_v52, %v557_v54  ;;  %v441_v58 = vadd.f32 %v1408_v39, %v440_v57 }
 0x152   :  { %v559_v61 = vrot.slane %v558_v59, 1  ;;  %v547_v0 = vmul.f32 %v1426_v60, %v441_v58 }
 0x153   :  { %v425_v1 = vpop.f32.mrf.mxu1 }
 0x154   :  { %v582_v2 = vmax.f32 %v546_v62, %v547_v0  ;;  %v426_v3 = vadd.f32 %v1408_v39, %v425_v1  ;;  %v560_v4 = vmax.f32 %v558_v59, %v559_v61 }
 0x156   :  { %v583_v6 = vrot.slane %v582_v2, 4  ;;  %v541_v8 = vmul.f32 %v1420_v53, %v426_v3  ;;  %v610_v12 = vsub.f32 %v538_v45, %v560_v4  ;;  %v611_v15 = vsub.f32 %v539_v46, %v560_v4 }
 0x157   :  { %v443_v9 = vpop.f32.mrf.mxu3 }
 0x158   :  { %v584_v10 = vmax.f32 %v582_v2, %v583_v6  ;;  %v561_v11 = vmax.f32 %v540_v5, %v541_v8  ;;  %v626_v19 = vmul.f32 1.442695, %v610_v12  ;;  %v628_v22 = vmul.f32 1.442695, %v611_v15 }
 0x159   :  { %v444_v23 = vadd.f32 %v1408_v39, %v443_v9 }
 0x15a   :  { %v585_v13 = vrot.slane %v584_v10, 2  ;;  %v562_v14 = vrot.slane %v561_v11, 4  ;;  %1118 = vpow2.f32 %v626_v19 }
 0x15b   :  { %v428_v16 = vpop.f32.mrf.mxu1  ;;  %1120 = vpow2.f32 %v628_v22  ;;  %v548_v26 = vmul.f32 %v1437_v27, %v444_v23  ;;  %v1464_v22 = vpop.permute.xlu0 %520 }
 0x15c   :  { %v586_v17 = vmax.f32 %v584_v10, %v585_v13  ;;  %v563_v18 = vmax.f32 %v561_v11, %v562_v14  ;;  %v429_v34 = vadd.f32 %v1408_v39, %v428_v16  ;;  %v1466_v23 = vpop.permute.xlu1 %525 }
 0x15e   :  { %v587_v20 = vrot.slane %v586_v17, 1  ;;  %v564_v21 = vrot.slane %v563_v18, 2  ;;  %v1447_v51 = vmul.f32 %v1401_v36, %v429_v34 }
 0x15f   :  { %v445_v24 = vpop.f32.mrf.mxu3 }
 0x160   :  { %v565_v25 = vmax.f32 %v563_v18, %v564_v21  ;;  %v446_v28 = vadd.f32 %v1408_v39, %v445_v24  ;;  %v588_v29 = vmax.f32 %v586_v17, %v587_v20  ;;  %v1119_v49 = vpop.eup %1118 }
 0x161   :  { %v1121_v54 = vpop.eup %1120  ;;  %v1455_v63 = vmul.f32 %v1119_v49, %v1399_v35 }
 0x162   :  { %v566_v30 = vrot.slane %v565_v25, 1  ;;  %v549_v32 = vmul.f32 %v1440_v31, %v446_v28  ;;  %v618_v43 = vsub.f32 %v546_v62, %v588_v29  ;;  %v619_v45 = vsub.f32 %v547_v0, %v588_v29 }
 0x163   :  { %v430_v33 = vpop.f32.mrf.mxu1  ;;  %v1458_v0 = vmul.f32 %v1121_v54, %v1403_v38 }
 0x164   :  { %v567_v37 = vmax.f32 %v565_v25, %v566_v30  ;;  %v589_v40 = vmax.f32 %v548_v26, %v549_v32  ;;  %v431_v42 = vadd.f32 %v1408_v39, %v430_v33  ;;  %v642_v59 = vmul.f32 1.442695, %v618_v43 }
 0x165   :  { %v644_v61 = vmul.f32 1.442695, %v619_v45  ;;  %v674_v10 = vadd.f32 %v1458_v0, %v1455_v63 }
 0x166   :  { %v590_v46 = vrot.slane %v589_v40, 4  ;;  %v612_v50 = vsub.f32 %v540_v5, %v567_v37  ;;  %v1450_v52 = vmul.f32 %v1414_v44, %v431_v42  ;;  %v613_v55 = vsub.f32 %v541_v8, %v567_v37 }
 0x167   :  { %v448_v48 = vpop.f32.mrf.mxu3  ;;  %1122 = vpow2.f32 %v642_v59  ;;  %v675_v13 = vrot.slane %v674_v10, 4 }
 0x168   :  { %v591_v57 = vmax.f32 %v589_v40, %v590_v46  ;;  %v568_v58 = vmax.f32 %v1447_v51, %v1450_v52  ;;  %v630_v1 = vmul.f32 1.442695, %v612_v50  ;;  %v632_v3 = vmul.f32 1.442695, %v613_v55 }
 0x169   :  { %1124 = vpow2.f32 %v644_v61  ;;  %v449_v15 = vadd.f32 %v1408_v39, %v448_v48  ;;  %v676_v25 = vadd.f32 %v675_v13, %v674_v10 }
 0x16a   :  { %v592_v62 = vrot.slane %v591_v57, 2  ;;  %v569_v2 = vrot.slane %v568_v58, 4  ;;  %1126 = vpow2.f32 %v630_v1 }
 0x16b   :  { %v433_v5 = vpop.f32.mrf.mxu1  ;;  %1128 = vpow2.f32 %v632_v3  ;;  %v1469_v28 = vmul.f32 %v1464_v22, %v449_v15  ;;  %v677_v45 = vrot.slane %v676_v25, 2 }
 0x16c   :  { %v593_v4 = vmax.f32 %v591_v57, %v592_v62  ;;  %v570_v8 = vmax.f32 %v568_v58, %v569_v2  ;;  %v434_v50 = vadd.f32 %v1408_v39, %v433_v5 }
 0x16d   :  { %v1123_v38 = vpop.eup %1122  ;;  %v678_v2 = vadd.f32 %v677_v45, %v676_v25  ;;  %v1536_v25 = vpop.permute.xlu0 %535 }
 0x16e   :  { %v594_v6 = vrot.slane %v593_v4, 1  ;;  %v571_v12 = vrot.slane %v570_v8, 2 }
 0x16f   :  { %v450_v9 = vpop.f32.mrf.mxu3  ;;  %v1125_v17 = vpop.eup %1124  ;;  %v679_v13 = vrot.slane %v678_v2, 1 }
 0x170   :  { %v595_v35 = vmax.f32 %v593_v4, %v594_v6  ;;  %v451_v16 = vadd.f32 %v1408_v39, %v450_v9  ;;  %v1127_v19 = vpop.eup %1126  ;;  %v572_v24 = vmax.f32 %v570_v8, %v571_v12  ;;  %v1516_v9 = vld [vmem:[%s1634_s0 + $0x8] sm:$0xff]  }
 0x171   :  { %v1129_v21 = vpop.eup %1128  ;;  %v1481_v37 = vmul.f32 %v1127_v19, %v1411_v41  ;;  %v1495_v41 = vld [vmem:[%s1634_s0 + $0x20] sm:$0xff]  }
 0x172   :  { %v620_v11 = vsub.f32 %v548_v26, %v595_v35  ;;  %v621_v14 = vsub.f32 %v549_v32, %v595_v35  ;;  %v1472_v29 = vmul.f32 %v1466_v23, %v451_v16  ;;  %v1475_v26 = vmul.f32 %v1123_v38, %v1423_v56  ;;  %v40_v56 = vld [vmem:[%s1634_s0] sm:$0xff]  }
 0x173   :  { %v435_v30 = vpop.f32.mrf.mxu1  ;;  %v1478_v32 = vmul.f32 %v1125_v17, %v1426_v60  ;;  %v573_v33 = vrot.slane %v572_v24, 1  ;;  %v1484_v40 = vmul.f32 %v1129_v21, %v1420_v53  ;;  %v778_v54 = vunpack.c.l.bf16 %v40_v56 }
 0x174   :  { %v646_v18 = vmul.f32 1.442695, %v620_v11  ;;  %v648_v20 = vmul.f32 1.442695, %v621_v14  ;;  %v596_v42 = vmax.f32 %v1469_v28, %v1472_v29  ;;  %v436_v60 = vadd.f32 %v1408_v39, %v435_v30  ;;  %v1530_v14 = vld [vmem:[%s1634_s0 + $0x28] sm:$0xff]  }
 0x175   :  { %v574_v43 = vmax.f32 %v572_v24, %v573_v33  ;;  %v702_v53 = vadd.f32 %v1478_v32, %v1475_v26  ;;  %v779_v55 = vunpack.c.h.bf16 %v40_v56  ;;  %v681_v57 = vadd.f32 %v1484_v40, %v1481_v37 }
 0x176   :  { %1130 = vpow2.f32 %v646_v18  ;;  %v597_v46 = vrot.slane %v596_v42, 4  ;;  %v1505_v62 = vmul.f32 %v1433_v7, %v436_v60  ;;  %v786_v3 = vunpack.c.l.bf16 %v1495_v41 }
 0x177   :  { %v453_v34 = vpop.f32.mrf.mxu3  ;;  %1132 = vpow2.f32 %v648_v20  ;;  %v614_v48 = vsub.f32 %v1447_v51, %v574_v43  ;;  %v615_v49 = vsub.f32 %v1450_v52, %v574_v43  ;;  %v703_v4 = vrot.slane %v702_v53, 4 }
 0x178   :  { %v598_v59 = vmax.f32 %v596_v42, %v597_v46  ;;  %v1509_v52 = vmul.f32 %v1418_v47, %v434_v50  ;;  %v794_v6 = vmul.f32 %v778_v54, %v1455_v63  ;;  %v795_v8 = vmul.f32 %v779_v55, %v1458_v0 }
 0x179   :  { %v634_v61 = vmul.f32 1.442695, %v614_v48  ;;  %v636_v51 = vmul.f32 1.442695, %v615_v49  ;;  %v682_v10 = vrot.slane %v681_v57, 4  ;;  %v787_v0 = vunpack.c.h.bf16 %v1495_v41 }
 0x17a   :  { %v599_v5 = vrot.slane %v598_v59, 2  ;;  %v575_v38 = vmax.f32 %v1509_v52, %v1505_v62  ;;  %v454_v15 = vadd.f32 %v1408_v39, %v453_v34  ;;  %v780_v16 = vunpack.c.l.bf16 %v1516_v9  ;;  %v1541_v34 = vpop.permute.xlu2 %530 }
 0x17b   :  { %1134 = vpow2.f32 %v634_v61  ;;  %v810_v18 = vadd.f32 %v795_v8, %v794_v6  ;;  %v683_v19 = vadd.f32 %v682_v10, %v681_v57  ;;  %v781_v20 = vunpack.c.h.bf16 %v1516_v9 }
 0x17c   :  { %v1131_v58 = vpop.eup %1130  ;;  %1136 = vpow2.f32 %v636_v51  ;;  %v600_v12 = vmax.f32 %v598_v59, %v599_v5  ;;  %v576_v17 = vrot.slane %v575_v38, 4  ;;  %v788_v33 = vunpack.c.l.bf16 %v1530_v14  ;;  %v44_v51 = vld [vmem:[%s1634_s0 + $0x10] sm:$0xff]  }
 0x17d   :  { %v1133_v1 = vpop.eup %1132  ;;  %v1519_v35 = vmul.f32 %v1131_v58, %v1437_v27  ;;  %v704_v27 = vadd.f32 %v703_v4, %v702_v53  ;;  %v680_v60 = vadd.f32 %v679_v13, %v678_v2  ;;  %v1547_v46 = vmul.f32 %v1541_v34, %v454_v15 }
 0x17e   :  { %v1522_v11 = vmul.f32 %v1133_v1, %v1440_v31  ;;  %v601_v31 = vrot.slane %v600_v12, 1  ;;  %v577_v56 = vmax.f32 %v575_v38, %v576_v17  ;;  %v811_v50 = vrot.slane %v810_v18, 4 }
 0x17f   :  { %v455_v63 = vpop.f32.mrf.mxu3  ;;  %v705_v41 = vrot.slane %v704_v27, 2  ;;  %v684_v54 = vrot.slane %v683_v19, 2  ;;  %v802_v1 = vmul.f32 %v786_v3, %v1475_v26  ;;  %vm730_vm0 = vcmp.eq.f32.partialorder %v680_v60, 0.0 }
 0x180   :  { %v456_v21 = vadd.f32 %v1408_v39, %v455_v63  ;;  %v709_v30 = vadd.f32 %v1522_v11, %v1519_v35  ;;  %v602_v42 = vmax.f32 %v600_v12, %v601_v31  ;;  %v578_v55 = vrot.slane %v577_v56, 2 }
 0x181   :  { %v1135_v24 = vpop.eup %1134  ;;  %v789_v5 = vunpack.c.h.bf16 %v1530_v14  ;;  %v812_v9 = vadd.f32 %v811_v50, %v810_v18  ;;  %v685_v10 = vadd.f32 %v684_v54, %v683_v19  ;;  %v782_v38 = vunpack.c.l.bf16 %v44_v51 }
 0x182   :  { %v1137_v43 = vpop.eup %1136  ;;  %v1544_v45 = vmul.f32 %v1135_v24, %v1401_v36  ;;  %v1550_v39 = vmul.f32 %v1536_v25, %v456_v21  ;;  %v622_v48 = vsub.f32 %v1469_v28, %v602_v42  ;;  %v623_v49 = vsub.f32 %v1472_v29, %v602_v42 }
 0x183   :  { %v1553_v53 = vmul.f32 %v1137_v43, %v1414_v44  ;;  %v710_v57 = vrot.slane %v709_v30, 4  ;;  %v803_v44 = vmul.f32 %v787_v0, %v1478_v32  ;;  %v579_v2 = vmax.f32 %v577_v56, %v578_v55 }
 0x184   :  { %v603_v36 = vmax.f32 %v1547_v46, %v1550_v39  ;;  %v650_v58 = vmul.f32 1.442695, %v622_v48  ;;  %v652_v61 = vmul.f32 1.442695, %v623_v49  ;;  %v706_v29 = vadd.f32 %v705_v41, %v704_v27 }
 0x185   :  { %v688_v59 = vadd.f32 %v1553_v53, %v1544_v45  ;;  %v580_v6 = vrot.slane %v579_v2, 1  ;;  %v711_v26 = vadd.f32 %v710_v57, %v709_v30  ;;  %v1222_v32 = vmov 0.0  }
 0x186   :  { %v604_v28 = vrot.slane %v603_v36, 4  ;;  %1138 = vpow2.f32 %v650_v58  ;;  %v1027_v12 = vsel %vm730_vm0, 1.0, %v1222_v32  ;;  %v707_v0 = vrot.slane %v706_v29, 1  ;;  %v46_v58 = vld [vmem:[%s1634_s0 + $0x18] sm:$0xff]  }
 0x187   :  { %v689_v4 = vrot.slane %v688_v59, 4  ;;  %1140 = vpow2.f32 %v652_v61  ;;  %v581_v63 = vmax.f32 %v579_v2, %v580_v6  ;;  %v838_v15 = vadd.f32 %v803_v44, %v802_v1 }
 0x188   :  { %v605_v8 = vmax.f32 %v603_v36, %v604_v28  ;;  %v796_v27 = vmul.f32 %v780_v16, %v1481_v37  ;;  %v797_v31 = vmul.f32 %v781_v20, %v1484_v40  ;;  %v754_v30 = vadd.f32 %v1027_v12, %v680_v60 }
 0x189   :  { %v690_v3 = vadd.f32 %v689_v4, %v688_v59  ;;  %v616_v21 = vsub.f32 %v1509_v52, %v581_v63  ;;  %v617_v18 = vsub.f32 %v1505_v62, %v581_v63  ;;  %v813_v42 = vrot.slane %v812_v9, 2 }
 0x18a   :  { %v606_v13 = vrot.slane %v605_v8, 2  ;;  %v686_v56 = vrot.slane %v685_v10, 1  ;;  %v712_v43 = vrot.slane %v711_v26, 2  ;;  %v1575_v16 = vadd.f32 %v707_v0, %v706_v29  ;;  %v54_v0 = vld [vmem:[%s1634_s0 + $0x38] sm:$0xff]  }
 0x18b   :  { %v691_v17 = vrot.slane %v690_v3, 2  ;;  %v638_v49 = vmul.f32 1.442695, %v616_v21  ;;  %v640_v50 = vmul.f32 1.442695, %v617_v18  ;;  %v839_v40 = vrot.slane %v838_v15, 4 }
 0x18c   :  { %v607_v19 = vmax.f32 %v605_v8, %v606_v13  ;;  %v1139_v24 = vpop.eup %1138  ;;  %v817_v20 = vadd.f32 %v797_v31, %v796_v27  ;;  %v783_v54 = vunpack.c.h.bf16 %v44_v51  ;;  %v1578_v55 = vadd.f32 1e-20, %v754_v30 }
 0x18d   :  { %v1141_v41 = vpop.eup %1140  ;;  %v1573_v48 = vmul.f32 %v1139_v24, %v1464_v22  ;;  %v692_v62 = vadd.f32 %v691_v17, %v690_v3  ;;  %1142 = vpow2.f32 %v638_v49  ;;  %v1580_v36 = vadd.f32 %v813_v42, %v812_v9 }
 0x18e   :  { %v608_v37 = vrot.slane %v607_v19, 1  ;;  %v671_v52 = vmul.f32 %v1141_v41, %v1466_v23  ;;  %v687_v57 = vadd.f32 %v686_v56, %v685_v10  ;;  %v713_v59 = vadd.f32 %v712_v43, %v711_v26 }
 0x18f   :  { %1144 = vpow2.f32 %v640_v50  ;;  %vm734_vm1 = vcmp.eq.f32.partialorder %v1575_v16, 0.0  ;;  %v1589_v1 = vadd.f32 %v839_v40, %v838_v15  ;;  %v818_v44 = vrot.slane %v817_v20, 4 }
 0x190   :  { %v609_v60 = vmax.f32 %v607_v19, %v608_v37  ;;  %v716_v22 = vadd.f32 %v671_v52, %v1573_v48  ;;  %v804_v28 = vmul.f32 %v788_v33, %v1519_v35  ;;  %v693_v29 = vrot.slane %v692_v62, 1 }
 0x191   :  { %v798_v6 = vmul.f32 %v782_v38, %v1544_v45  ;;  %v799_v8 = vmul.f32 %v783_v54, %v1553_v53  ;;  %v784_v9 = vunpack.c.l.bf16 %v46_v58  ;;  %vm731_vm2 = vcmp.eq.f32.partialorder %v687_v57, 0.0 }
 0x192   :  { %v624_v61 = vsub.f32 %v1547_v46, %v609_v60  ;;  %v625_v23 = vsub.f32 %v1550_v39, %v609_v60  ;;  %v717_v2 = vrot.slane %v716_v22, 4  ;;  %v52_v46 = vld [vmem:[%s1634_s0 + $0x30] sm:$0xff]   ;;  %v714_v26 = vrot.slane %v713_v59, 1  ;;  %s1223_s0 = smov [#allocation5]  }
 0x193   :  { %v1143_v10 = vpop.eup %1142  ;;  %v805_v35 = vmul.f32 %v789_v5, %v1522_v11  ;;  %v785_v45 = vunpack.c.h.bf16 %v46_v58  ;;  %v1603_v12 = vadd.f32 %v818_v44, %v817_v20  ;;  %v694_v38 = vadd.f32 %v693_v29, %v692_v62  ;;  %s903_s30 = sshll.u32 %s1223_s0, 4  ;;  %s904_s30 = int_to_ptr.vmem [resolvable:$true] %s903_s30 }
 0x194   :  { %v654_v51 = vmul.f32 1.442695, %v624_v61  ;;  %v656_v4 = vmul.f32 1.442695, %v625_v23  ;;  %v718_v39 = vadd.f32 %v717_v2, %v716_v22  ;;  %v664_v3 = vmul.f32 %v1143_v10, %v1418_v47 }
 0x195   :  { %v1145_v53 = vpop.eup %1144  ;;  %v790_v63 = vunpack.c.l.bf16 %v52_v46  ;;  %v791_v13 = vunpack.c.h.bf16 %v52_v46  ;;  %v824_v15 = vadd.f32 %v799_v8, %v798_v6  ;;  %v1031_v47 = vsel %vm734_vm1, 1.0, %v1222_v32 }
 0x196   :  { %1146 = vpow2.f32 %v654_v51  ;;  %v719_v33 = vrot.slane %v718_v39, 2  ;;  %v665_v11 = vmul.f32 %v1145_v53, %v1433_v7  ;;  %v800_v14 = vmul.f32 %v784_v9, %v664_v3 }
 0x197   :  { %1148 = vpow2.f32 %v656_v4  ;;  %v1028_v5 = vsel %vm731_vm2, 1.0, %v1222_v32  ;;  %v715_v31 = vadd.f32 %v714_v26, %v713_v59  ;;  %v845_v17 = vadd.f32 %v805_v35, %v804_v28 }
 0x198   :  { %v720_v27 = vadd.f32 %v719_v33, %v718_v39  ;;  %v695_v18 = vadd.f32 %v665_v11, %v664_v3  ;;  %v801_v19 = vmul.f32 %v785_v45, %v665_v11  ;;  %v792_v24 = vunpack.c.l.bf16 %v54_v0 }
 0x199   :  { %vm732_vm3 = vcmp.eq.f32.partialorder %v694_v38, 0.0  ;;  %v806_v42 = vmul.f32 %v790_v63, %v1573_v48  ;;  %v807_v56 = vmul.f32 %v791_v13, %v671_v52  ;;  %v793_v7 = vunpack.c.h.bf16 %v54_v0 }
 0x19a   :  { %v721_v21 = vrot.slane %v720_v27, 1  ;;  %v825_v41 = vrot.slane %v824_v15, 4  ;;  %v696_v49 = vrot.slane %v695_v18, 4  ;;  %v831_v50 = vadd.f32 %v801_v19, %v800_v14 }
 0x19b   :  { %v755_v40 = vadd.f32 %v1028_v5, %v687_v57  ;;  %vm735_vm4 = vcmp.eq.f32.partialorder %v715_v31, 0.0  ;;  %v846_v20 = vrot.slane %v845_v17, 4  ;;  %v1029_v54 = vsel %vm732_vm3, 1.0, %v1222_v32 }
 0x19c   :  { %v1147_v30 = vpop.eup %1146  ;;  %v722_v60 = vadd.f32 %v721_v21, %v720_v27  ;;  %v697_v22 = vadd.f32 %v696_v49, %v695_v18  ;;  %v852_v58 = vadd.f32 %v807_v56, %v806_v42  ;;  %v832_v48 = vrot.slane %v831_v50, 4 }
 0x19d   :  { %v1149_v43 = vpop.eup %1148  ;;  %v672_v37 = vmul.f32 %v1147_v30, %v1541_v34  ;;  %1150 = vrcp.f32 %v1578_v55  ;;  %v820_v23 = vrot.slane %v1603_v12, 2  ;;  %v826_v44 = vadd.f32 %v825_v41, %v824_v15 }
 0x19e   :  { %v673_v62 = vmul.f32 %v1149_v43, %v1536_v25  ;;  %v698_v34 = vrot.slane %v697_v22, 2  ;;  %v758_v57 = vadd.f32 %v1031_v47, %v1575_v16  ;;  %v756_v2 = vadd.f32 %v1029_v54, %v694_v38 }
 0x19f   :  { %v808_v59 = vmul.f32 %v792_v24, %v672_v37  ;;  %v763_v29 = vadd.f32 1e-20, %v755_v40  ;;  %vm736_vm5 = vcmp.eq.f32.partialorder %v722_v60, 0.0  ;;  %v1032_v4 = vsel %vm735_vm4, 1.0, %v1222_v32 }
 0x1a0   :  { %v723_v52 = vadd.f32 %v673_v62, %v672_v37  ;;  %v809_v61 = vmul.f32 %v793_v7, %v673_v62  ;;  %v699_v51 = vadd.f32 %v698_v34, %v697_v22  ;;  %v847_v6 = vadd.f32 %v846_v20, %v845_v17 }
 0x1a1   :  { %v853_v8 = vrot.slane %v852_v58, 4  ;;  %v833_v46 = vadd.f32 %v832_v48, %v831_v50  ;;  %v841_v55 = vrot.slane %v1589_v1, 2  ;;  %v827_v9 = vrot.slane %v826_v44, 2 }
 0x1a2   :  { %v724_v28 = vrot.slane %v723_v52, 4  ;;  %v859_v25 = vadd.f32 %v809_v61, %v808_v59  ;;  %v700_v10 = vrot.slane %v699_v51, 1  ;;  %v764_v35 = vadd.f32 1e-20, %v756_v2 }
 0x1a3   :  { %v1033_v33 = vsel %vm736_vm5, 1.0, %v1222_v32  ;;  %v759_v3 = vadd.f32 %v1032_v4, %v715_v31  ;;  %v1151_v45 = vpop.eup %1150  ;;  %v766_v53 = vadd.f32 1e-20, %v758_v57  ;;  %1152 = vrcp.f32 %v763_v29 }
 0x1a4   :  { %v725_v39 = vadd.f32 %v724_v28, %v723_v52  ;;  %v860_v26 = vrot.slane %v859_v25, 4  ;;  %v821_v38 = vadd.f32 %v820_v23, %v1603_v12  ;;  %v701_v63 = vadd.f32 %v700_v10, %v699_v51 }
 0x1a5   :  { %v834_v13 = vrot.slane %v833_v46, 2  ;;  %v848_v15 = vrot.slane %v847_v6, 2  ;;  %v854_v27 = vadd.f32 %v853_v8, %v852_v58  ;;  %v828_v11 = vadd.f32 %v827_v9, %v826_v44 }
 0x1a6   :  { %v726_v16 = vrot.slane %v725_v39, 2  ;;  %vm733_vm6 = vcmp.eq.f32.partialorder %v701_v63, 0.0  ;;  %v760_v14 = vadd.f32 %v1033_v33, %v722_v60  ;;  %v861_v47 = vadd.f32 %v860_v26, %v859_v25 }
 0x1a7   :  { %1154 = vrcp.f32 %v764_v35  ;;  %v1030_v5 = vsel %vm733_vm6, 1.0, %v1222_v32  ;;  %v767_v21 = vadd.f32 1e-20, %v759_v3  ;;  %v815_v31 = vrot.slane %v1580_v36, 1 }
 0x1a8   :  { %v727_v0 = vadd.f32 %v726_v16, %v725_v39  ;;  %v822_v18 = vrot.slane %v821_v38, 1  ;;  %v757_v19 = vadd.f32 %v1030_v5, %v701_v63  ;;  %v842_v12 = vadd.f32 %v841_v55, %v1589_v1 }
 0x1a9   :  { %v835_v24 = vadd.f32 %v834_v13, %v833_v46  ;;  %1156 = vrcp.f32 %v766_v53  ;;  %v855_v42 = vrot.slane %v854_v27, 2  ;;  %v1153_v56 = vpop.eup %1152  ;;  %v829_v7 = vrot.slane %v828_v11, 1 }
 0x1aa   :  { %v728_v17 = vrot.slane %v727_v0, 1  ;;  %v765_v43 = vadd.f32 1e-20, %v757_v19  ;;  %v768_v41 = vadd.f32 1e-20, %v760_v14  ;;  %v862_v49 = vrot.slane %v861_v47, 2 }
 0x1ab   :  { %1158 = vrcp.f32 %v767_v21  ;;  %v849_v50 = vadd.f32 %v848_v15, %v847_v6  ;;  %v816_v37 = vadd.f32 %v815_v31, %v1580_v36  ;;  %v823_v62 = vadd.f32 %v822_v18, %v821_v38 }
 0x1ac   :  { %v729_v30 = vadd.f32 %v728_v17, %v727_v0  ;;  %1160 = vrcp.f32 %v765_v43  ;;  %v836_v54 = vrot.slane %v835_v24, 1  ;;  %v856_v60 = vadd.f32 %v855_v42, %v854_v27 }
 0x1ad   :  { %v1155_v20 = vpop.eup %1154  ;;  %1162 = vrcp.f32 %v768_v41  ;;  %v830_v22 = vadd.f32 %v829_v7, %v828_v11  ;;  %v843_v59 = vrot.slane %v842_v12, 1  ;;  %v863_v58 = vadd.f32 %v862_v49, %v861_v47 }
 0x1ae   :  { %vm737_vm7 = vcmp.eq.f32.partialorder %v729_v30, 0.0  ;;  %v850_v61 = vrot.slane %v849_v50, 1  ;;  %v867_v23 = vmul.f32 %v1153_v56, %v823_v62  ;;  %v866_v44 = vmul.f32 %v1151_v45, %v816_v37 }
 0x1af   :  { %v1034_v40 = vsel %vm737_vm7, 1.0, %v1222_v32  ;;  %v1157_v48 = vpop.eup %1156  ;;  %v868_v34 = vmul.f32 %v1155_v20, %v830_v22  ;;  %v837_v57 = vadd.f32 %v836_v54, %v835_v24  ;;  %v857_v32 = vrot.slane %v856_v60, 1 }
 0x1b0   :  { %v761_v1 = vadd.f32 %v1034_v40, %v729_v30  ;;  %v844_v28 = vadd.f32 %v843_v59, %v842_v12  ;;  %v864_v25 = vrot.slane %v863_v58, 1  ;;  %v851_v29 = vadd.f32 %v850_v61, %v849_v50 }
 0x1b1   :  { %v1159_v36 = vpop.eup %1158  ;;  %v883_v4 = vsel %vm882_vm8, %v867_v23, %v866_v44  ;;  %v858_v39 = vadd.f32 %v857_v32, %v856_v60 }
 0x1b2   :  { %v769_v52 = vadd.f32 1e-20, %v761_v1  ;;  %v1161_v2 = vpop.eup %1160  ;;  %v870_v8 = vmul.f32 %v1157_v48, %v844_v28  ;;  %v885_v46 = vsel %vm884_vm9, %v868_v34, %v883_v4  ;;  %v871_v55 = vmul.f32 %v1159_v36, %v851_v29 }
 0x1b3   :  { %v869_v51 = vmul.f32 %v1161_v2, %v837_v57  ;;  %v1163_v6 = vpop.eup %1162  ;;  %v865_v10 = vadd.f32 %v864_v25, %v863_v58 }
 0x1b4   :  { %1164 = vrcp.f32 %v769_v52  ;;  %v872_v16 = vmul.f32 %v1163_v6, %v858_v39 }
 0x1b5   :  { %v887_v9 = vsel %vm886_vm10, %v869_v51, %v885_v46 }
 0x1b6   :  { %v889_v26 = vsel %vm888_vm11, %v870_v8, %v887_v9 }
 0x1b7   :  { %v891_v33 = vsel %vm890_vm12, %v871_v55, %v889_v26 }
 0x1b8   :  { %v893_v45 = vsel %vm892_vm13, %v872_v16, %v891_v33 }
 0x1ba   :  { %v1165_v35 = vpop.eup %1164 }
 0x1bb   :  { %v873_v3 = vmul.f32 %v1165_v35, %v865_v10 }
 0x1bd   :  { %v895_v53 = vsel %vm894_vm14, %v873_v3, %v893_v45 }
 0x1be   :  { %897 = vst [vmem:[#allocation5] sm:$0xff] %v895_v53 }
 0x1bf   :  { %908 = dma.vmem_to_hbm [thread:$0]  %s904_s30, 128, %s906_s8, [#allocation4]  }
 0x1c0   :  { %1216 = dma.done.wait [#allocation4], 128  }
 0x1c1   :  { %1217 = vsyncadd [#allocation4], 4294967168 }
 0x1c2   :  { %913 = vsyncpa [#allocation3], 1 }
 0x1c3   :  { %914 = vsyncpa [#allocation4], 1 }

</bundles_post_ra>
